<compile_context>
chip_gen: v7x
topology: tpu7x:2x2x1
jax: 0.10.0
libtpu: 0.0.40
codegen_flags: <defaults>
</compile_context>

<pallas_src>
import jax
import jax.numpy as jnp
from jax.experimental import pallas as pl
from jax.experimental.pallas import tpu as pltpu

# --- synthetic "config" (small, deterministic) -------------------------------
V = 16        # len(config.ns)   (vocab size)
E = 50        # embedding_dim
H = 64        # GRU hidden_size
B = 4         # batch size
MAX_LEN = 8   # config.max_len
PAD = 0       # config.ns.PAD
SOS = 1       # config.ns.SOS


# --- Pallas kernel: whole greedy decode in one invocation ---------------------
def decoder_kernel(emb_gates_ref, whh_ref, bhh_ref, wfc_ref, bfc_ref, h0_ref,
                   out_ref, h_ref):
    # Hoist all weight loads out of the unrolled loop (loaded once into vregs).
    emb_gates = emb_gates_ref[...]            # [V, 3H]  (emb @ W_ih^T + b_ih)
    whh_all = whh_ref[...]                    # [H, 3H]  (W_hh^T)
    bhh_all = bhh_ref[...]                    # [1, 3H]
    wfc = wfc_ref[...]                        # [H, V]
    bfc = bfc_ref[...]                        # [1, V]

    iota = jax.lax.broadcasted_iota(jnp.int32, (B, V), 1)

    # Loop carries live in vregs: hidden state + one-hot of previous token.
    h = h0_ref[...]                                              # [B, H]
    onehot = (iota == SOS).astype(jnp.float32)                   # [B, V]

    outs = []
    for t in range(MAX_LEN):                                     # static unroll
        # Fused input-side gates (embedding lookup + W_ih + b_ih in one dot).
        gi = jnp.dot(onehot, emb_gates,
                     preferred_element_type=jnp.float32)         # [B, 3H]
        # Fused hidden-side gates.
        gh = jnp.dot(h, whh_all,
                     preferred_element_type=jnp.float32) + bhh_all  # [B, 3H]

        gi_r, gi_z, gi_n = gi[:, :H], gi[:, H:2 * H], gi[:, 2 * H:]
        gh_r, gh_z, gh_n = gh[:, :H], gh[:, H:2 * H], gh[:, 2 * H:]

        # GRU cell (PyTorch gate order r, z, n; b_hn stays inside r * (...)).
        r = jax.nn.sigmoid(gi_r + gh_r)
        z = jax.nn.sigmoid(gi_z + gh_z)
        n = jnp.tanh(gi_n + r * gh_n)
        h = (1.0 - z) * n + z * h                                # [B, H]

        # fc + log_softmax
        logits = jnp.dot(h, wfc,
                         preferred_element_type=jnp.float32) + bfc  # [B, V]
        m = jnp.max(logits, axis=-1, keepdims=True)
        shifted = logits - m
        lse = jnp.log(jnp.sum(jnp.exp(shifted), axis=-1, keepdims=True))
        outs.append(shifted - lse)                               # log-probs [B, V]

        # Greedy argmax reusing `m` (argmax(logp) == argmax(logits));
        # min-index tie-break matches jnp.argmax first-occurrence semantics.
        idx = jnp.min(jnp.where(logits == m, iota, V),
                      axis=-1, keepdims=True)                    # [B, 1]
        onehot = (iota == idx).astype(jnp.float32)

    # Single lane-dense writeback: [B, MAX_LEN*V] = [4, 128] -> unmasked vst.
    out_ref[...] = jnp.concatenate(outs, axis=-1)
    h_ref[...] = h                                               # single store


# --- wrapper ------------------------------------------------------------------
def decoder_forward(encoder_hidden, params):
    """encoder_hidden: [1, B, H] (num_layers, batch, hidden), like PyTorch GRU."""
    emb, w_ih, w_hh, b_ih, b_hh, w_fc, b_fc = params
    h0 = encoder_hidden[0]                                       # [B, H]

    # One-time XLA-side weight fusion (exact: one-hot rows sum to 1, so b_ih
    # folds into the embedding-gate table).
    emb_gates = emb @ w_ih.T + b_ih[None, :]                     # [V, 3H]
    whh_all = w_hh.T                                             # [H, 3H]
    bhh_all = b_hh[None, :]                                      # [1, 3H]
    wfc_t = w_fc.T                                               # [H, V]
    bfc = b_fc[None, :]                                          # [1, V]

    grid_spec = pltpu.PrefetchScalarGridSpec(
        num_scalar_prefetch=0,
        grid=(1,),                                               # single invocation
        in_specs=[
            pl.BlockSpec((V, 3 * H), lambda i: (0, 0)),          # emb_gates
            pl.BlockSpec((H, 3 * H), lambda i: (0, 0)),          # W_hh^T
            pl.BlockSpec((1, 3 * H), lambda i: (0, 0)),          # b_hh
            pl.BlockSpec((H, V), lambda i: (0, 0)),              # fc weight^T
            pl.BlockSpec((1, V), lambda i: (0, 0)),              # fc bias
            pl.BlockSpec((B, H), lambda i: (0, 0)),              # encoder hidden
        ],
        out_specs=[
            pl.BlockSpec((B, MAX_LEN * V), lambda i: (0, 0)),    # log-probs (lane-dense)
            pl.BlockSpec((B, H), lambda i: (0, 0)),              # final hidden
        ],
    )

    outs_flat, h_final = pl.pallas_call(
        decoder_kernel,
        out_shape=(jax.ShapeDtypeStruct((B, MAX_LEN * V), jnp.float32),
                   jax.ShapeDtypeStruct((B, H), jnp.float32)),
        grid_spec=grid_spec,
        compiler_params=pltpu.CompilerParams(
            dimension_semantics=("arbitrary",)),                 # sequential recurrence
    )(emb_gates, whh_all, bhh_all, wfc_t, bfc, h0)

    decoder_outputs = outs_flat.reshape(B, MAX_LEN, V)           # free reshape
    decoder_hidden = h_final[None]                               # [1, B, H]
    return decoder_outputs, decoder_hidden


# --- pure-JAX reference (mirrors PyTorch forward exactly) ----------------------
def reference_forward(encoder_hidden, params):
    emb, w_ih, w_hh, b_ih, b_hh, w_fc, b_fc = params
    h = encoder_hidden[0]
    tok = jnp.full((B,), SOS, dtype=jnp.int32)
    w_ir, w_iz, w_in = jnp.split(w_ih, 3, axis=0)
    w_hr, w_hz, w_hn = jnp.split(w_hh, 3, axis=0)
    b_ir, b_iz, b_in = jnp.split(b_ih, 3)
    b_hr, b_hz, b_hn = jnp.split(b_hh, 3)
    outs = []
    for _ in range(MAX_LEN):
        x = emb[tok]
        r = jax.nn.sigmoid(x @ w_ir.T + b_ir + h @ w_hr.T + b_hr)
        z = jax.nn.sigmoid(x @ w_iz.T + b_iz + h @ w_hz.T + b_hz)
        n = jnp.tanh(x @ w_in.T + b_in + r * (h @ w_hn.T + b_hn))
        h = (1.0 - z) * n + z * h
        logp = jax.nn.log_softmax(h @ w_fc.T + b_fc, axis=-1)
        outs.append(logp)
        tok = jnp.argmax(logp, axis=-1).astype(jnp.int32)
    return jnp.stack(outs, axis=1), h[None]


if __name__ == "__main__":
    key = jax.random.PRNGKey(0)
    keys = jax.random.split(key, 8)
    s = 1.0 / (H ** 0.5)

    emb = jax.random.normal(keys[0], (V, E), jnp.float32)
    emb = emb.at[PAD].set(0.0)                               # padding_idx row = 0
    w_ih = jax.random.uniform(keys[1], (3 * H, E), jnp.float32, -s, s)
    w_hh = jax.random.uniform(keys[2], (3 * H, H), jnp.float32, -s, s)
    b_ih = jax.random.uniform(keys[3], (3 * H,), jnp.float32, -s, s)
    b_hh = jax.random.uniform(keys[4], (3 * H,), jnp.float32, -s, s)
    w_fc = jax.random.uniform(keys[5], (V, H), jnp.float32, -s, s)
    b_fc = jax.random.uniform(keys[6], (V,), jnp.float32, -s, s)
    encoder_hidden = jax.random.normal(keys[7], (1, B, H), jnp.float32)

    params = (emb, w_ih, w_hh, b_ih, b_hh, w_fc, b_fc)

    out, hid = decoder_forward(encoder_hidden, params)
    jax.block_until_ready((out, hid))

    ref_out, ref_hid = reference_forward(encoder_hidden, params)
    assert out.shape == (B, MAX_LEN, V) and hid.shape == (1, B, H)
    assert jnp.allclose(out, ref_out, atol=2e-4), "log-prob mismatch vs reference"
    assert jnp.allclose(hid, ref_hid, atol=2e-4), "hidden mismatch vs reference"

    print("KERNEL_OK")
</pallas_src>

<mosaic_0001>
module attributes {stable_mosaic.version = 11 : i64} {
  func.func @decoder_kernel(%arg0: i32, %arg1: memref<16x192xf32, #tpu.memory_space<vmem>>, %arg2: memref<64x192xf32, #tpu.memory_space<vmem>>, %arg3: memref<1x192xf32, #tpu.memory_space<vmem>>, %arg4: memref<64x16xf32, #tpu.memory_space<vmem>>, %arg5: memref<1x16xf32, #tpu.memory_space<vmem>>, %arg6: memref<4x64xf32, #tpu.memory_space<vmem>>, %arg7: memref<4x128xf32, #tpu.memory_space<vmem>>, %arg8: memref<4x64xf32, #tpu.memory_space<vmem>>) attributes {dimension_semantics = [#tpu.dimension_semantics<arbitrary>], iteration_bounds = array<i64: 1>, scalar_prefetch = 0 : i64, scratch_operands = 0 : i64, tpu.core_type = #tpu.core_type<tc>, window_params = [{pipeline_mode = #tpu.pipeline_mode<synchronous>, transform_indices = @transform_0, window_bounds = array<i64: 16, 192>}, {pipeline_mode = #tpu.pipeline_mode<synchronous>, transform_indices = @transform_1, window_bounds = array<i64: 64, 192>}, {pipeline_mode = #tpu.pipeline_mode<synchronous>, transform_indices = @transform_2, window_bounds = array<i64: 1, 192>}, {pipeline_mode = #tpu.pipeline_mode<synchronous>, transform_indices = @transform_3, window_bounds = array<i64: 64, 16>}, {pipeline_mode = #tpu.pipeline_mode<synchronous>, transform_indices = @transform_4, window_bounds = array<i64: 1, 16>}, {pipeline_mode = #tpu.pipeline_mode<synchronous>, transform_indices = @transform_5, window_bounds = array<i64: 4, 64>}, {pipeline_mode = #tpu.pipeline_mode<synchronous>, transform_indices = @transform_6, window_bounds = array<i64: 4, 128>}, {pipeline_mode = #tpu.pipeline_mode<synchronous>, transform_indices = @transform_7, window_bounds = array<i64: 4, 64>}]} {
    %c0 = arith.constant 0 : index
    %c0_0 = arith.constant 0 : index
    %0 = vector.load %arg1[%c0, %c0_0] : memref<16x192xf32, #tpu.memory_space<vmem>>, vector<16x192xf32>
    %c0_1 = arith.constant 0 : index
    %c0_2 = arith.constant 0 : index
    %1 = vector.load %arg2[%c0_1, %c0_2] : memref<64x192xf32, #tpu.memory_space<vmem>>, vector<64x192xf32>
    %c0_3 = arith.constant 0 : index
    %c0_4 = arith.constant 0 : index
    %2 = vector.load %arg3[%c0_3, %c0_4] : memref<1x192xf32, #tpu.memory_space<vmem>>, vector<1x192xf32>
    %c0_5 = arith.constant 0 : index
    %c0_6 = arith.constant 0 : index
    %3 = vector.load %arg4[%c0_5, %c0_6] : memref<64x16xf32, #tpu.memory_space<vmem>>, vector<64x16xf32>
    %c0_7 = arith.constant 0 : index
    %c0_8 = arith.constant 0 : index
    %4 = vector.load %arg5[%c0_7, %c0_8] : memref<1x16xf32, #tpu.memory_space<vmem>>, vector<1x16xf32>
    %5 = tpu.iota {dimensions = array<i32: 1>} : vector<4x16xi32>
    %c0_9 = arith.constant 0 : index
    %c0_10 = arith.constant 0 : index
    %6 = vector.load %arg6[%c0_9, %c0_10] : memref<4x64xf32, #tpu.memory_space<vmem>>, vector<4x64xf32>
    %c1_i32 = arith.constant 1 : i32
    %7 = vector.broadcast %c1_i32 : i32 to vector<4x16xi32>
    %8 = arith.cmpi eq, %5, %7 : vector<4x16xi32>
    %9 = arith.extui %8 : vector<4x16xi1> to vector<4x16xi32>
    %10 = arith.sitofp %9 : vector<4x16xi32> to vector<4x16xf32>
    %cst = arith.constant dense<0.000000e+00> : vector<4x192xf32>
    %11 = tpu.matmul %10, %0, %cst {dimension_numbers = #tpu.dot_dimension_numbers<[1], [0], [0], [1], [0, 0, 1, 1], [], []>} : vector<4x16xf32>, vector<16x192xf32>, vector<4x192xf32> -> vector<4x192xf32>
    %cst_11 = arith.constant dense<0.000000e+00> : vector<4x192xf32>
    %12 = tpu.matmul %6, %1, %cst_11 {dimension_numbers = #tpu.dot_dimension_numbers<[1], [0], [0], [1], [0, 0, 1, 1], [], []>} : vector<4x64xf32>, vector<64x192xf32>, vector<4x192xf32> -> vector<4x192xf32>
    %13 = vector.broadcast %2 : vector<1x192xf32> to vector<4x192xf32>
    %14 = arith.addf %12, %13 : vector<4x192xf32>
    %15 = vector.extract_strided_slice %11 {offsets = [0, 0], sizes = [4, 64], strides = [1, 1]} : vector<4x192xf32> to vector<4x64xf32>
    %16 = vector.extract_strided_slice %11 {offsets = [0, 64], sizes = [4, 64], strides = [1, 1]} : vector<4x192xf32> to vector<4x64xf32>
    %17 = vector.extract_strided_slice %11 {offsets = [0, 128], sizes = [4, 64], strides = [1, 1]} : vector<4x192xf32> to vector<4x64xf32>
    %18 = vector.extract_strided_slice %14 {offsets = [0, 0], sizes = [4, 64], strides = [1, 1]} : vector<4x192xf32> to vector<4x64xf32>
    %19 = vector.extract_strided_slice %14 {offsets = [0, 64], sizes = [4, 64], strides = [1, 1]} : vector<4x192xf32> to vector<4x64xf32>
    %20 = vector.extract_strided_slice %14 {offsets = [0, 128], sizes = [4, 64], strides = [1, 1]} : vector<4x192xf32> to vector<4x64xf32>
    %21 = arith.addf %15, %18 : vector<4x64xf32>
    %22 = arith.negf %21 : vector<4x64xf32>
    %23 = math.exp %22 : vector<4x64xf32>
    %cst_12 = arith.constant 1.000000e+00 : f32
    %24 = vector.broadcast %cst_12 : f32 to vector<4x64xf32>
    %25 = arith.addf %24, %23 : vector<4x64xf32>
    %26 = arith.divf %24, %25 : vector<4x64xf32>
    %27 = arith.addf %16, %19 : vector<4x64xf32>
    %28 = arith.negf %27 : vector<4x64xf32>
    %29 = math.exp %28 : vector<4x64xf32>
    %cst_13 = arith.constant 1.000000e+00 : f32
    %30 = vector.broadcast %cst_13 : f32 to vector<4x64xf32>
    %31 = arith.addf %30, %29 : vector<4x64xf32>
    %32 = arith.divf %30, %31 : vector<4x64xf32>
    %33 = arith.mulf %26, %20 : vector<4x64xf32>
    %34 = arith.addf %17, %33 : vector<4x64xf32>
    %35 = math.tanh %34 : vector<4x64xf32>
    %cst_14 = arith.constant 1.000000e+00 : f32
    %36 = vector.broadcast %cst_14 : f32 to vector<4x64xf32>
    %37 = arith.subf %36, %32 : vector<4x64xf32>
    %38 = arith.mulf %37, %35 : vector<4x64xf32>
    %39 = arith.mulf %32, %6 : vector<4x64xf32>
    %40 = arith.addf %38, %39 : vector<4x64xf32>
    %cst_15 = arith.constant dense<0.000000e+00> : vector<4x16xf32>
    %41 = tpu.matmul %40, %3, %cst_15 {dimension_numbers = #tpu.dot_dimension_numbers<[1], [0], [0], [1], [0, 0, 1, 1], [], []>} : vector<4x64xf32>, vector<64x16xf32>, vector<4x16xf32> -> vector<4x16xf32>
    %42 = vector.broadcast %4 : vector<1x16xf32> to vector<4x16xf32>
    %43 = arith.addf %41, %42 : vector<4x16xf32>
    %cst_16 = arith.constant dense<0xFF800000> : vector<4xf32>
    %44 = vector.multi_reduction <maximumf>, %43, %cst_16 [1] : vector<4x16xf32> to vector<4xf32>
    %45 = vector.shape_cast %44 : vector<4xf32> to vector<4x1xf32>
    %46 = vector.broadcast %45 : vector<4x1xf32> to vector<4x16xf32>
    %47 = arith.subf %43, %46 : vector<4x16xf32>
    %48 = math.exp %47 : vector<4x16xf32>
    %cst_17 = arith.constant dense<0.000000e+00> : vector<4xf32>
    %49 = vector.multi_reduction <add>, %48, %cst_17 [1] : vector<4x16xf32> to vector<4xf32>
    %50 = vector.shape_cast %49 : vector<4xf32> to vector<4x1xf32>
    %51 = math.log %50 : vector<4x1xf32>
    %52 = vector.broadcast %51 : vector<4x1xf32> to vector<4x16xf32>
    %53 = arith.subf %47, %52 : vector<4x16xf32>
    %54 = vector.broadcast %45 : vector<4x1xf32> to vector<4x16xf32>
    %55 = arith.cmpf oeq, %43, %54 : vector<4x16xf32>
    %c16_i32 = arith.constant 16 : i32
    %56 = vector.broadcast %c16_i32 : i32 to vector<4x16xi32>
    %57 = arith.select %55, %5, %56 : vector<4x16xi1>, vector<4x16xi32>
    %cst_18 = arith.constant dense<2147483647> : vector<4xi32>
    %58 = vector.multi_reduction <minsi>, %57, %cst_18 [1] : vector<4x16xi32> to vector<4xi32>
    %59 = vector.shape_cast %58 : vector<4xi32> to vector<4x1xi32>
    %60 = vector.broadcast %59 : vector<4x1xi32> to vector<4x16xi32>
    %61 = arith.cmpi eq, %5, %60 : vector<4x16xi32>
    %62 = arith.extui %61 : vector<4x16xi1> to vector<4x16xi32>
    %63 = arith.sitofp %62 : vector<4x16xi32> to vector<4x16xf32>
    %cst_19 = arith.constant dense<0.000000e+00> : vector<4x192xf32>
    %64 = tpu.matmul %63, %0, %cst_19 {dimension_numbers = #tpu.dot_dimension_numbers<[1], [0], [0], [1], [0, 0, 1, 1], [], []>} : vector<4x16xf32>, vector<16x192xf32>, vector<4x192xf32> -> vector<4x192xf32>
    %cst_20 = arith.constant dense<0.000000e+00> : vector<4x192xf32>
    %65 = tpu.matmul %40, %1, %cst_20 {dimension_numbers = #tpu.dot_dimension_numbers<[1], [0], [0], [1], [0, 0, 1, 1], [], []>} : vector<4x64xf32>, vector<64x192xf32>, vector<4x192xf32> -> vector<4x192xf32>
    %66 = vector.broadcast %2 : vector<1x192xf32> to vector<4x192xf32>
    %67 = arith.addf %65, %66 : vector<4x192xf32>
    %68 = vector.extract_strided_slice %64 {offsets = [0, 0], sizes = [4, 64], strides = [1, 1]} : vector<4x192xf32> to vector<4x64xf32>
    %69 = vector.extract_strided_slice %64 {offsets = [0, 64], sizes = [4, 64], strides = [1, 1]} : vector<4x192xf32> to vector<4x64xf32>
    %70 = vector.extract_strided_slice %64 {offsets = [0, 128], sizes = [4, 64], strides = [1, 1]} : vector<4x192xf32> to vector<4x64xf32>
    %71 = vector.extract_strided_slice %67 {offsets = [0, 0], sizes = [4, 64], strides = [1, 1]} : vector<4x192xf32> to vector<4x64xf32>
    %72 = vector.extract_strided_slice %67 {offsets = [0, 64], sizes = [4, 64], strides = [1, 1]} : vector<4x192xf32> to vector<4x64xf32>
    %73 = vector.extract_strided_slice %67 {offsets = [0, 128], sizes = [4, 64], strides = [1, 1]} : vector<4x192xf32> to vector<4x64xf32>
    %74 = arith.addf %68, %71 : vector<4x64xf32>
    %75 = arith.negf %74 : vector<4x64xf32>
    %76 = math.exp %75 : vector<4x64xf32>
    %cst_21 = arith.constant 1.000000e+00 : f32
    %77 = vector.broadcast %cst_21 : f32 to vector<4x64xf32>
    %78 = arith.addf %77, %76 : vector<4x64xf32>
    %79 = arith.divf %77, %78 : vector<4x64xf32>
    %80 = arith.addf %69, %72 : vector<4x64xf32>
    %81 = arith.negf %80 : vector<4x64xf32>
    %82 = math.exp %81 : vector<4x64xf32>
    %cst_22 = arith.constant 1.000000e+00 : f32
    %83 = vector.broadcast %cst_22 : f32 to vector<4x64xf32>
    %84 = arith.addf %83, %82 : vector<4x64xf32>
    %85 = arith.divf %83, %84 : vector<4x64xf32>
    %86 = arith.mulf %79, %73 : vector<4x64xf32>
    %87 = arith.addf %70, %86 : vector<4x64xf32>
    %88 = math.tanh %87 : vector<4x64xf32>
    %cst_23 = arith.constant 1.000000e+00 : f32
    %89 = vector.broadcast %cst_23 : f32 to vector<4x64xf32>
    %90 = arith.subf %89, %85 : vector<4x64xf32>
    %91 = arith.mulf %90, %88 : vector<4x64xf32>
    %92 = arith.mulf %85, %40 : vector<4x64xf32>
    %93 = arith.addf %91, %92 : vector<4x64xf32>
    %cst_24 = arith.constant dense<0.000000e+00> : vector<4x16xf32>
    %94 = tpu.matmul %93, %3, %cst_24 {dimension_numbers = #tpu.dot_dimension_numbers<[1], [0], [0], [1], [0, 0, 1, 1], [], []>} : vector<4x64xf32>, vector<64x16xf32>, vector<4x16xf32> -> vector<4x16xf32>
    %95 = vector.broadcast %4 : vector<1x16xf32> to vector<4x16xf32>
    %96 = arith.addf %94, %95 : vector<4x16xf32>
    %cst_25 = arith.constant dense<0xFF800000> : vector<4xf32>
    %97 = vector.multi_reduction <maximumf>, %96, %cst_25 [1] : vector<4x16xf32> to vector<4xf32>
    %98 = vector.shape_cast %97 : vector<4xf32> to vector<4x1xf32>
    %99 = vector.broadcast %98 : vector<4x1xf32> to vector<4x16xf32>
    %100 = arith.subf %96, %99 : vector<4x16xf32>
    %101 = math.exp %100 : vector<4x16xf32>
    %cst_26 = arith.constant dense<0.000000e+00> : vector<4xf32>
    %102 = vector.multi_reduction <add>, %101, %cst_26 [1] : vector<4x16xf32> to vector<4xf32>
    %103 = vector.shape_cast %102 : vector<4xf32> to vector<4x1xf32>
    %104 = math.log %103 : vector<4x1xf32>
    %105 = vector.broadcast %104 : vector<4x1xf32> to vector<4x16xf32>
    %106 = arith.subf %100, %105 : vector<4x16xf32>
    %107 = vector.broadcast %98 : vector<4x1xf32> to vector<4x16xf32>
    %108 = arith.cmpf oeq, %96, %107 : vector<4x16xf32>
    %c16_i32_27 = arith.constant 16 : i32
    %109 = vector.broadcast %c16_i32_27 : i32 to vector<4x16xi32>
    %110 = arith.select %108, %5, %109 : vector<4x16xi1>, vector<4x16xi32>
    %cst_28 = arith.constant dense<2147483647> : vector<4xi32>
    %111 = vector.multi_reduction <minsi>, %110, %cst_28 [1] : vector<4x16xi32> to vector<4xi32>
    %112 = vector.shape_cast %111 : vector<4xi32> to vector<4x1xi32>
    %113 = vector.broadcast %112 : vector<4x1xi32> to vector<4x16xi32>
    %114 = arith.cmpi eq, %5, %113 : vector<4x16xi32>
    %115 = arith.extui %114 : vector<4x16xi1> to vector<4x16xi32>
    %116 = arith.sitofp %115 : vector<4x16xi32> to vector<4x16xf32>
    %cst_29 = arith.constant dense<0.000000e+00> : vector<4x192xf32>
    %117 = tpu.matmul %116, %0, %cst_29 {dimension_numbers = #tpu.dot_dimension_numbers<[1], [0], [0], [1], [0, 0, 1, 1], [], []>} : vector<4x16xf32>, vector<16x192xf32>, vector<4x192xf32> -> vector<4x192xf32>
    %cst_30 = arith.constant dense<0.000000e+00> : vector<4x192xf32>
    %118 = tpu.matmul %93, %1, %cst_30 {dimension_numbers = #tpu.dot_dimension_numbers<[1], [0], [0], [1], [0, 0, 1, 1], [], []>} : vector<4x64xf32>, vector<64x192xf32>, vector<4x192xf32> -> vector<4x192xf32>
    %119 = vector.broadcast %2 : vector<1x192xf32> to vector<4x192xf32>
    %120 = arith.addf %118, %119 : vector<4x192xf32>
    %121 = vector.extract_strided_slice %117 {offsets = [0, 0], sizes = [4, 64], strides = [1, 1]} : vector<4x192xf32> to vector<4x64xf32>
    %122 = vector.extract_strided_slice %117 {offsets = [0, 64], sizes = [4, 64], strides = [1, 1]} : vector<4x192xf32> to vector<4x64xf32>
    %123 = vector.extract_strided_slice %117 {offsets = [0, 128], sizes = [4, 64], strides = [1, 1]} : vector<4x192xf32> to vector<4x64xf32>
    %124 = vector.extract_strided_slice %120 {offsets = [0, 0], sizes = [4, 64], strides = [1, 1]} : vector<4x192xf32> to vector<4x64xf32>
    %125 = vector.extract_strided_slice %120 {offsets = [0, 64], sizes = [4, 64], strides = [1, 1]} : vector<4x192xf32> to vector<4x64xf32>
    %126 = vector.extract_strided_slice %120 {offsets = [0, 128], sizes = [4, 64], strides = [1, 1]} : vector<4x192xf32> to vector<4x64xf32>
    %127 = arith.addf %121, %124 : vector<4x64xf32>
    %128 = arith.negf %127 : vector<4x64xf32>
    %129 = math.exp %128 : vector<4x64xf32>
    %cst_31 = arith.constant 1.000000e+00 : f32
    %130 = vector.broadcast %cst_31 : f32 to vector<4x64xf32>
    %131 = arith.addf %130, %129 : vector<4x64xf32>
    %132 = arith.divf %130, %131 : vector<4x64xf32>
    %133 = arith.addf %122, %125 : vector<4x64xf32>
    %134 = arith.negf %133 : vector<4x64xf32>
    %135 = math.exp %134 : vector<4x64xf32>
    %cst_32 = arith.constant 1.000000e+00 : f32
    %136 = vector.broadcast %cst_32 : f32 to vector<4x64xf32>
    %137 = arith.addf %136, %135 : vector<4x64xf32>
    %138 = arith.divf %136, %137 : vector<4x64xf32>
    %139 = arith.mulf %132, %126 : vector<4x64xf32>
    %140 = arith.addf %123, %139 : vector<4x64xf32>
    %141 = math.tanh %140 : vector<4x64xf32>
    %cst_33 = arith.constant 1.000000e+00 : f32
    %142 = vector.broadcast %cst_33 : f32 to vector<4x64xf32>
    %143 = arith.subf %142, %138 : vector<4x64xf32>
    %144 = arith.mulf %143, %141 : vector<4x64xf32>
    %145 = arith.mulf %138, %93 : vector<4x64xf32>
    %146 = arith.addf %144, %145 : vector<4x64xf32>
    %cst_34 = arith.constant dense<0.000000e+00> : vector<4x16xf32>
    %147 = tpu.matmul %146, %3, %cst_34 {dimension_numbers = #tpu.dot_dimension_numbers<[1], [0], [0], [1], [0, 0, 1, 1], [], []>} : vector<4x64xf32>, vector<64x16xf32>, vector<4x16xf32> -> vector<4x16xf32>
    %148 = vector.broadcast %4 : vector<1x16xf32> to vector<4x16xf32>
    %149 = arith.addf %147, %148 : vector<4x16xf32>
    %cst_35 = arith.constant dense<0xFF800000> : vector<4xf32>
    %150 = vector.multi_reduction <maximumf>, %149, %cst_35 [1] : vector<4x16xf32> to vector<4xf32>
    %151 = vector.shape_cast %150 : vector<4xf32> to vector<4x1xf32>
    %152 = vector.broadcast %151 : vector<4x1xf32> to vector<4x16xf32>
    %153 = arith.subf %149, %152 : vector<4x16xf32>
    %154 = math.exp %153 : vector<4x16xf32>
    %cst_36 = arith.constant dense<0.000000e+00> : vector<4xf32>
    %155 = vector.multi_reduction <add>, %154, %cst_36 [1] : vector<4x16xf32> to vector<4xf32>
    %156 = vector.shape_cast %155 : vector<4xf32> to vector<4x1xf32>
    %157 = math.log %156 : vector<4x1xf32>
    %158 = vector.broadcast %157 : vector<4x1xf32> to vector<4x16xf32>
    %159 = arith.subf %153, %158 : vector<4x16xf32>
    %160 = vector.broadcast %151 : vector<4x1xf32> to vector<4x16xf32>
    %161 = arith.cmpf oeq, %149, %160 : vector<4x16xf32>
    %c16_i32_37 = arith.constant 16 : i32
    %162 = vector.broadcast %c16_i32_37 : i32 to vector<4x16xi32>
    %163 = arith.select %161, %5, %162 : vector<4x16xi1>, vector<4x16xi32>
    %cst_38 = arith.constant dense<2147483647> : vector<4xi32>
    %164 = vector.multi_reduction <minsi>, %163, %cst_38 [1] : vector<4x16xi32> to vector<4xi32>
    %165 = vector.shape_cast %164 : vector<4xi32> to vector<4x1xi32>
    %166 = vector.broadcast %165 : vector<4x1xi32> to vector<4x16xi32>
    %167 = arith.cmpi eq, %5, %166 : vector<4x16xi32>
    %168 = arith.extui %167 : vector<4x16xi1> to vector<4x16xi32>
    %169 = arith.sitofp %168 : vector<4x16xi32> to vector<4x16xf32>
    %cst_39 = arith.constant dense<0.000000e+00> : vector<4x192xf32>
    %170 = tpu.matmul %169, %0, %cst_39 {dimension_numbers = #tpu.dot_dimension_numbers<[1], [0], [0], [1], [0, 0, 1, 1], [], []>} : vector<4x16xf32>, vector<16x192xf32>, vector<4x192xf32> -> vector<4x192xf32>
    %cst_40 = arith.constant dense<0.000000e+00> : vector<4x192xf32>
    %171 = tpu.matmul %146, %1, %cst_40 {dimension_numbers = #tpu.dot_dimension_numbers<[1], [0], [0], [1], [0, 0, 1, 1], [], []>} : vector<4x64xf32>, vector<64x192xf32>, vector<4x192xf32> -> vector<4x192xf32>
    %172 = vector.broadcast %2 : vector<1x192xf32> to vector<4x192xf32>
    %173 = arith.addf %171, %172 : vector<4x192xf32>
    %174 = vector.extract_strided_slice %170 {offsets = [0, 0], sizes = [4, 64], strides = [1, 1]} : vector<4x192xf32> to vector<4x64xf32>
    %175 = vector.extract_strided_slice %170 {offsets = [0, 64], sizes = [4, 64], strides = [1, 1]} : vector<4x192xf32> to vector<4x64xf32>
    %176 = vector.extract_strided_slice %170 {offsets = [0, 128], sizes = [4, 64], strides = [1, 1]} : vector<4x192xf32> to vector<4x64xf32>
    %177 = vector.extract_strided_slice %173 {offsets = [0, 0], sizes = [4, 64], strides = [1, 1]} : vector<4x192xf32> to vector<4x64xf32>
    %178 = vector.extract_strided_slice %173 {offsets = [0, 64], sizes = [4, 64], strides = [1, 1]} : vector<4x192xf32> to vector<4x64xf32>
    %179 = vector.extract_strided_slice %173 {offsets = [0, 128], sizes = [4, 64], strides = [1, 1]} : vector<4x192xf32> to vector<4x64xf32>
    %180 = arith.addf %174, %177 : vector<4x64xf32>
    %181 = arith.negf %180 : vector<4x64xf32>
    %182 = math.exp %181 : vector<4x64xf32>
    %cst_41 = arith.constant 1.000000e+00 : f32
    %183 = vector.broadcast %cst_41 : f32 to vector<4x64xf32>
    %184 = arith.addf %183, %182 : vector<4x64xf32>
    %185 = arith.divf %183, %184 : vector<4x64xf32>
    %186 = arith.addf %175, %178 : vector<4x64xf32>
    %187 = arith.negf %186 : vector<4x64xf32>
    %188 = math.exp %187 : vector<4x64xf32>
    %cst_42 = arith.constant 1.000000e+00 : f32
    %189 = vector.broadcast %cst_42 : f32 to vector<4x64xf32>
    %190 = arith.addf %189, %188 : vector<4x64xf32>
    %191 = arith.divf %189, %190 : vector<4x64xf32>
    %192 = arith.mulf %185, %179 : vector<4x64xf32>
    %193 = arith.addf %176, %192 : vector<4x64xf32>
    %194 = math.tanh %193 : vector<4x64xf32>
    %cst_43 = arith.constant 1.000000e+00 : f32
    %195 = vector.broadcast %cst_43 : f32 to vector<4x64xf32>
    %196 = arith.subf %195, %191 : vector<4x64xf32>
    %197 = arith.mulf %196, %194 : vector<4x64xf32>
    %198 = arith.mulf %191, %146 : vector<4x64xf32>
    %199 = arith.addf %197, %198 : vector<4x64xf32>
    %cst_44 = arith.constant dense<0.000000e+00> : vector<4x16xf32>
    %200 = tpu.matmul %199, %3, %cst_44 {dimension_numbers = #tpu.dot_dimension_numbers<[1], [0], [0], [1], [0, 0, 1, 1], [], []>} : vector<4x64xf32>, vector<64x16xf32>, vector<4x16xf32> -> vector<4x16xf32>
    %201 = vector.broadcast %4 : vector<1x16xf32> to vector<4x16xf32>
    %202 = arith.addf %200, %201 : vector<4x16xf32>
    %cst_45 = arith.constant dense<0xFF800000> : vector<4xf32>
    %203 = vector.multi_reduction <maximumf>, %202, %cst_45 [1] : vector<4x16xf32> to vector<4xf32>
    %204 = vector.shape_cast %203 : vector<4xf32> to vector<4x1xf32>
    %205 = vector.broadcast %204 : vector<4x1xf32> to vector<4x16xf32>
    %206 = arith.subf %202, %205 : vector<4x16xf32>
    %207 = math.exp %206 : vector<4x16xf32>
    %cst_46 = arith.constant dense<0.000000e+00> : vector<4xf32>
    %208 = vector.multi_reduction <add>, %207, %cst_46 [1] : vector<4x16xf32> to vector<4xf32>
    %209 = vector.shape_cast %208 : vector<4xf32> to vector<4x1xf32>
    %210 = math.log %209 : vector<4x1xf32>
    %211 = vector.broadcast %210 : vector<4x1xf32> to vector<4x16xf32>
    %212 = arith.subf %206, %211 : vector<4x16xf32>
    %213 = vector.broadcast %204 : vector<4x1xf32> to vector<4x16xf32>
    %214 = arith.cmpf oeq, %202, %213 : vector<4x16xf32>
    %c16_i32_47 = arith.constant 16 : i32
    %215 = vector.broadcast %c16_i32_47 : i32 to vector<4x16xi32>
    %216 = arith.select %214, %5, %215 : vector<4x16xi1>, vector<4x16xi32>
    %cst_48 = arith.constant dense<2147483647> : vector<4xi32>
    %217 = vector.multi_reduction <minsi>, %216, %cst_48 [1] : vector<4x16xi32> to vector<4xi32>
    %218 = vector.shape_cast %217 : vector<4xi32> to vector<4x1xi32>
    %219 = vector.broadcast %218 : vector<4x1xi32> to vector<4x16xi32>
    %220 = arith.cmpi eq, %5, %219 : vector<4x16xi32>
    %221 = arith.extui %220 : vector<4x16xi1> to vector<4x16xi32>
    %222 = arith.sitofp %221 : vector<4x16xi32> to vector<4x16xf32>
    %cst_49 = arith.constant dense<0.000000e+00> : vector<4x192xf32>
    %223 = tpu.matmul %222, %0, %cst_49 {dimension_numbers = #tpu.dot_dimension_numbers<[1], [0], [0], [1], [0, 0, 1, 1], [], []>} : vector<4x16xf32>, vector<16x192xf32>, vector<4x192xf32> -> vector<4x192xf32>
    %cst_50 = arith.constant dense<0.000000e+00> : vector<4x192xf32>
    %224 = tpu.matmul %199, %1, %cst_50 {dimension_numbers = #tpu.dot_dimension_numbers<[1], [0], [0], [1], [0, 0, 1, 1], [], []>} : vector<4x64xf32>, vector<64x192xf32>, vector<4x192xf32> -> vector<4x192xf32>
    %225 = vector.broadcast %2 : vector<1x192xf32> to vector<4x192xf32>
    %226 = arith.addf %224, %225 : vector<4x192xf32>
    %227 = vector.extract_strided_slice %223 {offsets = [0, 0], sizes = [4, 64], strides = [1, 1]} : vector<4x192xf32> to vector<4x64xf32>
    %228 = vector.extract_strided_slice %223 {offsets = [0, 64], sizes = [4, 64], strides = [1, 1]} : vector<4x192xf32> to vector<4x64xf32>
    %229 = vector.extract_strided_slice %223 {offsets = [0, 128], sizes = [4, 64], strides = [1, 1]} : vector<4x192xf32> to vector<4x64xf32>
    %230 = vector.extract_strided_slice %226 {offsets = [0, 0], sizes = [4, 64], strides = [1, 1]} : vector<4x192xf32> to vector<4x64xf32>
    %231 = vector.extract_strided_slice %226 {offsets = [0, 64], sizes = [4, 64], strides = [1, 1]} : vector<4x192xf32> to vector<4x64xf32>
    %232 = vector.extract_strided_slice %226 {offsets = [0, 128], sizes = [4, 64], strides = [1, 1]} : vector<4x192xf32> to vector<4x64xf32>
    %233 = arith.addf %227, %230 : vector<4x64xf32>
    %234 = arith.negf %233 : vector<4x64xf32>
    %235 = math.exp %234 : vector<4x64xf32>
    %cst_51 = arith.constant 1.000000e+00 : f32
    %236 = vector.broadcast %cst_51 : f32 to vector<4x64xf32>
    %237 = arith.addf %236, %235 : vector<4x64xf32>
    %238 = arith.divf %236, %237 : vector<4x64xf32>
    %239 = arith.addf %228, %231 : vector<4x64xf32>
    %240 = arith.negf %239 : vector<4x64xf32>
    %241 = math.exp %240 : vector<4x64xf32>
    %cst_52 = arith.constant 1.000000e+00 : f32
    %242 = vector.broadcast %cst_52 : f32 to vector<4x64xf32>
    %243 = arith.addf %242, %241 : vector<4x64xf32>
    %244 = arith.divf %242, %243 : vector<4x64xf32>
    %245 = arith.mulf %238, %232 : vector<4x64xf32>
    %246 = arith.addf %229, %245 : vector<4x64xf32>
    %247 = math.tanh %246 : vector<4x64xf32>
    %cst_53 = arith.constant 1.000000e+00 : f32
    %248 = vector.broadcast %cst_53 : f32 to vector<4x64xf32>
    %249 = arith.subf %248, %244 : vector<4x64xf32>
    %250 = arith.mulf %249, %247 : vector<4x64xf32>
    %251 = arith.mulf %244, %199 : vector<4x64xf32>
    %252 = arith.addf %250, %251 : vector<4x64xf32>
    %cst_54 = arith.constant dense<0.000000e+00> : vector<4x16xf32>
    %253 = tpu.matmul %252, %3, %cst_54 {dimension_numbers = #tpu.dot_dimension_numbers<[1], [0], [0], [1], [0, 0, 1, 1], [], []>} : vector<4x64xf32>, vector<64x16xf32>, vector<4x16xf32> -> vector<4x16xf32>
    %254 = vector.broadcast %4 : vector<1x16xf32> to vector<4x16xf32>
    %255 = arith.addf %253, %254 : vector<4x16xf32>
    %cst_55 = arith.constant dense<0xFF800000> : vector<4xf32>
    %256 = vector.multi_reduction <maximumf>, %255, %cst_55 [1] : vector<4x16xf32> to vector<4xf32>
    %257 = vector.shape_cast %256 : vector<4xf32> to vector<4x1xf32>
    %258 = vector.broadcast %257 : vector<4x1xf32> to vector<4x16xf32>
    %259 = arith.subf %255, %258 : vector<4x16xf32>
    %260 = math.exp %259 : vector<4x16xf32>
    %cst_56 = arith.constant dense<0.000000e+00> : vector<4xf32>
    %261 = vector.multi_reduction <add>, %260, %cst_56 [1] : vector<4x16xf32> to vector<4xf32>
    %262 = vector.shape_cast %261 : vector<4xf32> to vector<4x1xf32>
    %263 = math.log %262 : vector<4x1xf32>
    %264 = vector.broadcast %263 : vector<4x1xf32> to vector<4x16xf32>
    %265 = arith.subf %259, %264 : vector<4x16xf32>
    %266 = vector.broadcast %257 : vector<4x1xf32> to vector<4x16xf32>
    %267 = arith.cmpf oeq, %255, %266 : vector<4x16xf32>
    %c16_i32_57 = arith.constant 16 : i32
    %268 = vector.broadcast %c16_i32_57 : i32 to vector<4x16xi32>
    %269 = arith.select %267, %5, %268 : vector<4x16xi1>, vector<4x16xi32>
    %cst_58 = arith.constant dense<2147483647> : vector<4xi32>
    %270 = vector.multi_reduction <minsi>, %269, %cst_58 [1] : vector<4x16xi32> to vector<4xi32>
    %271 = vector.shape_cast %270 : vector<4xi32> to vector<4x1xi32>
    %272 = vector.broadcast %271 : vector<4x1xi32> to vector<4x16xi32>
    %273 = arith.cmpi eq, %5, %272 : vector<4x16xi32>
    %274 = arith.extui %273 : vector<4x16xi1> to vector<4x16xi32>
    %275 = arith.sitofp %274 : vector<4x16xi32> to vector<4x16xf32>
    %cst_59 = arith.constant dense<0.000000e+00> : vector<4x192xf32>
    %276 = tpu.matmul %275, %0, %cst_59 {dimension_numbers = #tpu.dot_dimension_numbers<[1], [0], [0], [1], [0, 0, 1, 1], [], []>} : vector<4x16xf32>, vector<16x192xf32>, vector<4x192xf32> -> vector<4x192xf32>
    %cst_60 = arith.constant dense<0.000000e+00> : vector<4x192xf32>
    %277 = tpu.matmul %252, %1, %cst_60 {dimension_numbers = #tpu.dot_dimension_numbers<[1], [0], [0], [1], [0, 0, 1, 1], [], []>} : vector<4x64xf32>, vector<64x192xf32>, vector<4x192xf32> -> vector<4x192xf32>
    %278 = vector.broadcast %2 : vector<1x192xf32> to vector<4x192xf32>
    %279 = arith.addf %277, %278 : vector<4x192xf32>
    %280 = vector.extract_strided_slice %276 {offsets = [0, 0], sizes = [4, 64], strides = [1, 1]} : vector<4x192xf32> to vector<4x64xf32>
    %281 = vector.extract_strided_slice %276 {offsets = [0, 64], sizes = [4, 64], strides = [1, 1]} : vector<4x192xf32> to vector<4x64xf32>
    %282 = vector.extract_strided_slice %276 {offsets = [0, 128], sizes = [4, 64], strides = [1, 1]} : vector<4x192xf32> to vector<4x64xf32>
    %283 = vector.extract_strided_slice %279 {offsets = [0, 0], sizes = [4, 64], strides = [1, 1]} : vector<4x192xf32> to vector<4x64xf32>
    %284 = vector.extract_strided_slice %279 {offsets = [0, 64], sizes = [4, 64], strides = [1, 1]} : vector<4x192xf32> to vector<4x64xf32>
    %285 = vector.extract_strided_slice %279 {offsets = [0, 128], sizes = [4, 64], strides = [1, 1]} : vector<4x192xf32> to vector<4x64xf32>
    %286 = arith.addf %280, %283 : vector<4x64xf32>
    %287 = arith.negf %286 : vector<4x64xf32>
    %288 = math.exp %287 : vector<4x64xf32>
    %cst_61 = arith.constant 1.000000e+00 : f32
    %289 = vector.broadcast %cst_61 : f32 to vector<4x64xf32>
    %290 = arith.addf %289, %288 : vector<4x64xf32>
    %291 = arith.divf %289, %290 : vector<4x64xf32>
    %292 = arith.addf %281, %284 : vector<4x64xf32>
    %293 = arith.negf %292 : vector<4x64xf32>
    %294 = math.exp %293 : vector<4x64xf32>
    %cst_62 = arith.constant 1.000000e+00 : f32
    %295 = vector.broadcast %cst_62 : f32 to vector<4x64xf32>
    %296 = arith.addf %295, %294 : vector<4x64xf32>
    %297 = arith.divf %295, %296 : vector<4x64xf32>
    %298 = arith.mulf %291, %285 : vector<4x64xf32>
    %299 = arith.addf %282, %298 : vector<4x64xf32>
    %300 = math.tanh %299 : vector<4x64xf32>
    %cst_63 = arith.constant 1.000000e+00 : f32
    %301 = vector.broadcast %cst_63 : f32 to vector<4x64xf32>
    %302 = arith.subf %301, %297 : vector<4x64xf32>
    %303 = arith.mulf %302, %300 : vector<4x64xf32>
    %304 = arith.mulf %297, %252 : vector<4x64xf32>
    %305 = arith.addf %303, %304 : vector<4x64xf32>
    %cst_64 = arith.constant dense<0.000000e+00> : vector<4x16xf32>
    %306 = tpu.matmul %305, %3, %cst_64 {dimension_numbers = #tpu.dot_dimension_numbers<[1], [0], [0], [1], [0, 0, 1, 1], [], []>} : vector<4x64xf32>, vector<64x16xf32>, vector<4x16xf32> -> vector<4x16xf32>
    %307 = vector.broadcast %4 : vector<1x16xf32> to vector<4x16xf32>
    %308 = arith.addf %306, %307 : vector<4x16xf32>
    %cst_65 = arith.constant dense<0xFF800000> : vector<4xf32>
    %309 = vector.multi_reduction <maximumf>, %308, %cst_65 [1] : vector<4x16xf32> to vector<4xf32>
    %310 = vector.shape_cast %309 : vector<4xf32> to vector<4x1xf32>
    %311 = vector.broadcast %310 : vector<4x1xf32> to vector<4x16xf32>
    %312 = arith.subf %308, %311 : vector<4x16xf32>
    %313 = math.exp %312 : vector<4x16xf32>
    %cst_66 = arith.constant dense<0.000000e+00> : vector<4xf32>
    %314 = vector.multi_reduction <add>, %313, %cst_66 [1] : vector<4x16xf32> to vector<4xf32>
    %315 = vector.shape_cast %314 : vector<4xf32> to vector<4x1xf32>
    %316 = math.log %315 : vector<4x1xf32>
    %317 = vector.broadcast %316 : vector<4x1xf32> to vector<4x16xf32>
    %318 = arith.subf %312, %317 : vector<4x16xf32>
    %319 = vector.broadcast %310 : vector<4x1xf32> to vector<4x16xf32>
    %320 = arith.cmpf oeq, %308, %319 : vector<4x16xf32>
    %c16_i32_67 = arith.constant 16 : i32
    %321 = vector.broadcast %c16_i32_67 : i32 to vector<4x16xi32>
    %322 = arith.select %320, %5, %321 : vector<4x16xi1>, vector<4x16xi32>
    %cst_68 = arith.constant dense<2147483647> : vector<4xi32>
    %323 = vector.multi_reduction <minsi>, %322, %cst_68 [1] : vector<4x16xi32> to vector<4xi32>
    %324 = vector.shape_cast %323 : vector<4xi32> to vector<4x1xi32>
    %325 = vector.broadcast %324 : vector<4x1xi32> to vector<4x16xi32>
    %326 = arith.cmpi eq, %5, %325 : vector<4x16xi32>
    %327 = arith.extui %326 : vector<4x16xi1> to vector<4x16xi32>
    %328 = arith.sitofp %327 : vector<4x16xi32> to vector<4x16xf32>
    %cst_69 = arith.constant dense<0.000000e+00> : vector<4x192xf32>
    %329 = tpu.matmul %328, %0, %cst_69 {dimension_numbers = #tpu.dot_dimension_numbers<[1], [0], [0], [1], [0, 0, 1, 1], [], []>} : vector<4x16xf32>, vector<16x192xf32>, vector<4x192xf32> -> vector<4x192xf32>
    %cst_70 = arith.constant dense<0.000000e+00> : vector<4x192xf32>
    %330 = tpu.matmul %305, %1, %cst_70 {dimension_numbers = #tpu.dot_dimension_numbers<[1], [0], [0], [1], [0, 0, 1, 1], [], []>} : vector<4x64xf32>, vector<64x192xf32>, vector<4x192xf32> -> vector<4x192xf32>
    %331 = vector.broadcast %2 : vector<1x192xf32> to vector<4x192xf32>
    %332 = arith.addf %330, %331 : vector<4x192xf32>
    %333 = vector.extract_strided_slice %329 {offsets = [0, 0], sizes = [4, 64], strides = [1, 1]} : vector<4x192xf32> to vector<4x64xf32>
    %334 = vector.extract_strided_slice %329 {offsets = [0, 64], sizes = [4, 64], strides = [1, 1]} : vector<4x192xf32> to vector<4x64xf32>
    %335 = vector.extract_strided_slice %329 {offsets = [0, 128], sizes = [4, 64], strides = [1, 1]} : vector<4x192xf32> to vector<4x64xf32>
    %336 = vector.extract_strided_slice %332 {offsets = [0, 0], sizes = [4, 64], strides = [1, 1]} : vector<4x192xf32> to vector<4x64xf32>
    %337 = vector.extract_strided_slice %332 {offsets = [0, 64], sizes = [4, 64], strides = [1, 1]} : vector<4x192xf32> to vector<4x64xf32>
    %338 = vector.extract_strided_slice %332 {offsets = [0, 128], sizes = [4, 64], strides = [1, 1]} : vector<4x192xf32> to vector<4x64xf32>
    %339 = arith.addf %333, %336 : vector<4x64xf32>
    %340 = arith.negf %339 : vector<4x64xf32>
    %341 = math.exp %340 : vector<4x64xf32>
    %cst_71 = arith.constant 1.000000e+00 : f32
    %342 = vector.broadcast %cst_71 : f32 to vector<4x64xf32>
    %343 = arith.addf %342, %341 : vector<4x64xf32>
    %344 = arith.divf %342, %343 : vector<4x64xf32>
    %345 = arith.addf %334, %337 : vector<4x64xf32>
    %346 = arith.negf %345 : vector<4x64xf32>
    %347 = math.exp %346 : vector<4x64xf32>
    %cst_72 = arith.constant 1.000000e+00 : f32
    %348 = vector.broadcast %cst_72 : f32 to vector<4x64xf32>
    %349 = arith.addf %348, %347 : vector<4x64xf32>
    %350 = arith.divf %348, %349 : vector<4x64xf32>
    %351 = arith.mulf %344, %338 : vector<4x64xf32>
    %352 = arith.addf %335, %351 : vector<4x64xf32>
    %353 = math.tanh %352 : vector<4x64xf32>
    %cst_73 = arith.constant 1.000000e+00 : f32
    %354 = vector.broadcast %cst_73 : f32 to vector<4x64xf32>
    %355 = arith.subf %354, %350 : vector<4x64xf32>
    %356 = arith.mulf %355, %353 : vector<4x64xf32>
    %357 = arith.mulf %350, %305 : vector<4x64xf32>
    %358 = arith.addf %356, %357 : vector<4x64xf32>
    %cst_74 = arith.constant dense<0.000000e+00> : vector<4x16xf32>
    %359 = tpu.matmul %358, %3, %cst_74 {dimension_numbers = #tpu.dot_dimension_numbers<[1], [0], [0], [1], [0, 0, 1, 1], [], []>} : vector<4x64xf32>, vector<64x16xf32>, vector<4x16xf32> -> vector<4x16xf32>
    %360 = vector.broadcast %4 : vector<1x16xf32> to vector<4x16xf32>
    %361 = arith.addf %359, %360 : vector<4x16xf32>
    %cst_75 = arith.constant dense<0xFF800000> : vector<4xf32>
    %362 = vector.multi_reduction <maximumf>, %361, %cst_75 [1] : vector<4x16xf32> to vector<4xf32>
    %363 = vector.shape_cast %362 : vector<4xf32> to vector<4x1xf32>
    %364 = vector.broadcast %363 : vector<4x1xf32> to vector<4x16xf32>
    %365 = arith.subf %361, %364 : vector<4x16xf32>
    %366 = math.exp %365 : vector<4x16xf32>
    %cst_76 = arith.constant dense<0.000000e+00> : vector<4xf32>
    %367 = vector.multi_reduction <add>, %366, %cst_76 [1] : vector<4x16xf32> to vector<4xf32>
    %368 = vector.shape_cast %367 : vector<4xf32> to vector<4x1xf32>
    %369 = math.log %368 : vector<4x1xf32>
    %370 = vector.broadcast %369 : vector<4x1xf32> to vector<4x16xf32>
    %371 = arith.subf %365, %370 : vector<4x16xf32>
    %372 = vector.broadcast %363 : vector<4x1xf32> to vector<4x16xf32>
    %373 = arith.cmpf oeq, %361, %372 : vector<4x16xf32>
    %c16_i32_77 = arith.constant 16 : i32
    %374 = vector.broadcast %c16_i32_77 : i32 to vector<4x16xi32>
    %375 = arith.select %373, %5, %374 : vector<4x16xi1>, vector<4x16xi32>
    %cst_78 = arith.constant dense<2147483647> : vector<4xi32>
    %376 = vector.multi_reduction <minsi>, %375, %cst_78 [1] : vector<4x16xi32> to vector<4xi32>
    %377 = vector.shape_cast %376 : vector<4xi32> to vector<4x1xi32>
    %378 = vector.broadcast %377 : vector<4x1xi32> to vector<4x16xi32>
    %379 = arith.cmpi eq, %5, %378 : vector<4x16xi32>
    %380 = arith.extui %379 : vector<4x16xi1> to vector<4x16xi32>
    %381 = arith.sitofp %380 : vector<4x16xi32> to vector<4x16xf32>
    %cst_79 = arith.constant dense<0.000000e+00> : vector<4x192xf32>
    %382 = tpu.matmul %381, %0, %cst_79 {dimension_numbers = #tpu.dot_dimension_numbers<[1], [0], [0], [1], [0, 0, 1, 1], [], []>} : vector<4x16xf32>, vector<16x192xf32>, vector<4x192xf32> -> vector<4x192xf32>
    %cst_80 = arith.constant dense<0.000000e+00> : vector<4x192xf32>
    %383 = tpu.matmul %358, %1, %cst_80 {dimension_numbers = #tpu.dot_dimension_numbers<[1], [0], [0], [1], [0, 0, 1, 1], [], []>} : vector<4x64xf32>, vector<64x192xf32>, vector<4x192xf32> -> vector<4x192xf32>
    %384 = vector.broadcast %2 : vector<1x192xf32> to vector<4x192xf32>
    %385 = arith.addf %383, %384 : vector<4x192xf32>
    %386 = vector.extract_strided_slice %382 {offsets = [0, 0], sizes = [4, 64], strides = [1, 1]} : vector<4x192xf32> to vector<4x64xf32>
    %387 = vector.extract_strided_slice %382 {offsets = [0, 64], sizes = [4, 64], strides = [1, 1]} : vector<4x192xf32> to vector<4x64xf32>
    %388 = vector.extract_strided_slice %382 {offsets = [0, 128], sizes = [4, 64], strides = [1, 1]} : vector<4x192xf32> to vector<4x64xf32>
    %389 = vector.extract_strided_slice %385 {offsets = [0, 0], sizes = [4, 64], strides = [1, 1]} : vector<4x192xf32> to vector<4x64xf32>
    %390 = vector.extract_strided_slice %385 {offsets = [0, 64], sizes = [4, 64], strides = [1, 1]} : vector<4x192xf32> to vector<4x64xf32>
    %391 = vector.extract_strided_slice %385 {offsets = [0, 128], sizes = [4, 64], strides = [1, 1]} : vector<4x192xf32> to vector<4x64xf32>
    %392 = arith.addf %386, %389 : vector<4x64xf32>
    %393 = arith.negf %392 : vector<4x64xf32>
    %394 = math.exp %393 : vector<4x64xf32>
    %cst_81 = arith.constant 1.000000e+00 : f32
    %395 = vector.broadcast %cst_81 : f32 to vector<4x64xf32>
    %396 = arith.addf %395, %394 : vector<4x64xf32>
    %397 = arith.divf %395, %396 : vector<4x64xf32>
    %398 = arith.addf %387, %390 : vector<4x64xf32>
    %399 = arith.negf %398 : vector<4x64xf32>
    %400 = math.exp %399 : vector<4x64xf32>
    %cst_82 = arith.constant 1.000000e+00 : f32
    %401 = vector.broadcast %cst_82 : f32 to vector<4x64xf32>
    %402 = arith.addf %401, %400 : vector<4x64xf32>
    %403 = arith.divf %401, %402 : vector<4x64xf32>
    %404 = arith.mulf %397, %391 : vector<4x64xf32>
    %405 = arith.addf %388, %404 : vector<4x64xf32>
    %406 = math.tanh %405 : vector<4x64xf32>
    %cst_83 = arith.constant 1.000000e+00 : f32
    %407 = vector.broadcast %cst_83 : f32 to vector<4x64xf32>
    %408 = arith.subf %407, %403 : vector<4x64xf32>
    %409 = arith.mulf %408, %406 : vector<4x64xf32>
    %410 = arith.mulf %403, %358 : vector<4x64xf32>
    %411 = arith.addf %409, %410 : vector<4x64xf32>
    %cst_84 = arith.constant dense<0.000000e+00> : vector<4x16xf32>
    %412 = tpu.matmul %411, %3, %cst_84 {dimension_numbers = #tpu.dot_dimension_numbers<[1], [0], [0], [1], [0, 0, 1, 1], [], []>} : vector<4x64xf32>, vector<64x16xf32>, vector<4x16xf32> -> vector<4x16xf32>
    %413 = vector.broadcast %4 : vector<1x16xf32> to vector<4x16xf32>
    %414 = arith.addf %412, %413 : vector<4x16xf32>
    %cst_85 = arith.constant dense<0xFF800000> : vector<4xf32>
    %415 = vector.multi_reduction <maximumf>, %414, %cst_85 [1] : vector<4x16xf32> to vector<4xf32>
    %416 = vector.shape_cast %415 : vector<4xf32> to vector<4x1xf32>
    %417 = vector.broadcast %416 : vector<4x1xf32> to vector<4x16xf32>
    %418 = arith.subf %414, %417 : vector<4x16xf32>
    %419 = math.exp %418 : vector<4x16xf32>
    %cst_86 = arith.constant dense<0.000000e+00> : vector<4xf32>
    %420 = vector.multi_reduction <add>, %419, %cst_86 [1] : vector<4x16xf32> to vector<4xf32>
    %421 = vector.shape_cast %420 : vector<4xf32> to vector<4x1xf32>
    %422 = math.log %421 : vector<4x1xf32>
    %423 = vector.broadcast %422 : vector<4x1xf32> to vector<4x16xf32>
    %424 = arith.subf %418, %423 : vector<4x16xf32>
    %425 = tpu.concatenate %53, %106, %159, %212, %265, %318, %371, %424 in 1 : vector<4x16xf32>, vector<4x16xf32>, vector<4x16xf32>, vector<4x16xf32>, vector<4x16xf32>, vector<4x16xf32>, vector<4x16xf32>, vector<4x16xf32> -> vector<4x128xf32>
    %c0_87 = arith.constant 0 : index
    %c0_88 = arith.constant 0 : index
    %426 = vector.load %arg7[%c0_87, %c0_88] : memref<4x128xf32, #tpu.memory_space<vmem>>, vector<4x128xf32>
    tpu.vector_store %arg7[%c0_87, %c0_88], %425 {strides = array<i32>} : memref<4x128xf32, #tpu.memory_space<vmem>>, vector<4x128xf32>,
    %c0_89 = arith.constant 0 : index
    %c0_90 = arith.constant 0 : index
    %427 = vector.load %arg8[%c0_89, %c0_90] : memref<4x64xf32, #tpu.memory_space<vmem>>, vector<4x64xf32>
    tpu.vector_store %arg8[%c0_89, %c0_90], %411 {strides = array<i32>} : memref<4x64xf32, #tpu.memory_space<vmem>>, vector<4x64xf32>,
    return
  }
  func.func @transform_0(%arg0: i32) -> (i32, i32) {
    %c0_i32 = arith.constant 0 : i32
    %c0_i32_0 = arith.constant 0 : i32
    %c0_i32_1 = arith.constant 0 : i32
    return %c0_i32, %c0_i32_0 : i32, i32
  }
  func.func @transform_1(%arg0: i32) -> (i32, i32) {
    %c0_i32 = arith.constant 0 : i32
    %c0_i32_0 = arith.constant 0 : i32
    %c0_i32_1 = arith.constant 0 : i32
    return %c0_i32, %c0_i32_0 : i32, i32
  }
  func.func @transform_2(%arg0: i32) -> (i32, i32) {
    %c0_i32 = arith.constant 0 : i32
    %c0_i32_0 = arith.constant 0 : i32
    %c0_i32_1 = arith.constant 0 : i32
    return %c0_i32, %c0_i32_0 : i32, i32
  }
  func.func @transform_3(%arg0: i32) -> (i32, i32) {
    %c0_i32 = arith.constant 0 : i32
    %c0_i32_0 = arith.constant 0 : i32
    %c0_i32_1 = arith.constant 0 : i32
    return %c0_i32, %c0_i32_0 : i32, i32
  }
  func.func @transform_4(%arg0: i32) -> (i32, i32) {
    %c0_i32 = arith.constant 0 : i32
    %c0_i32_0 = arith.constant 0 : i32
    %c0_i32_1 = arith.constant 0 : i32
    return %c0_i32, %c0_i32_0 : i32, i32
  }
  func.func @transform_5(%arg0: i32) -> (i32, i32) {
    %c0_i32 = arith.constant 0 : i32
    %c0_i32_0 = arith.constant 0 : i32
    %c0_i32_1 = arith.constant 0 : i32
    return %c0_i32, %c0_i32_0 : i32, i32
  }
  func.func @transform_6(%arg0: i32) -> (i32, i32) {
    %c0_i32 = arith.constant 0 : i32
    %c0_i32_0 = arith.constant 0 : i32
    %c0_i32_1 = arith.constant 0 : i32
    return %c0_i32, %c0_i32_0 : i32, i32
  }
  func.func @transform_7(%arg0: i32) -> (i32, i32) {
    %c0_i32 = arith.constant 0 : i32
    %c0_i32_0 = arith.constant 0 : i32
    %c0_i32_1 = arith.constant 0 : i32
    return %c0_i32, %c0_i32_0 : i32, i32
  }
}

</mosaic_0001>

<bundles_post_ra>
// kernel: tpu_custom_call.1
= control target key start
LH: loop header
LB: loop body
LE: loop exit
PB: predicated region body
PF: predicated region fallthrough
CT: control target
= control target key end

     0   :  { %13 = vsyncpa [#allocation3], 0  ;;  %s3588_s0 = inlined_call_operand.vmem [shape: f32[16,192], index: 0, kind: input, shape index: {}]   ;;  %s3589_s1 = inlined_call_operand.hbm [shape: f32[64,192], index: 1, kind: input, shape index: {}]   ;;  %s3590_s2 = inlined_call_operand.vmem [shape: f32[1,192], index: 2, kind: input, shape index: {}]   ;;  %s3591_s3 = inlined_call_operand.vmem [shape: f32[64,16], index: 3, kind: input, shape index: {}]   ;;  %s3592_s4 = inlined_call_operand.vmem [shape: f32[1,16], index: 4, kind: input, shape index: {}]   ;;  %s3593_s5 = inlined_call_operand.vmem [shape: f32[4,64], index: 5, kind: input, shape index: {}]   ;;  %s3594_s6 = inlined_call_operand.hbm [shape: f32[4,128], index: 6, kind: output, shape index: {0}]   ;;  %s3595_s7 = inlined_call_operand.hbm [shape: f32[4,64], index: 7, kind: output, shape index: {1}]  }
   0x1   :  { %14 = vsyncpa [#allocation4], 0 }
   0x2   :  { %15 = vsyncpa [#allocation7], 0  ;;  %s3004_s24 = smov [#allocation2]   ;;  %s2932_s28 = scalar_lea.hbm %s3589_s1, 2048 }
   0x3   :  { %s23_s25 = sshll.u32 %s3004_s24, 4  ;;  %p2933_p0 = scmp.ne.s32.totalorder %s3589_s1, %s2932_s28  ;;  %s24_s25 = int_to_ptr.vmem [resolvable:$true] %s23_s25 }
   0x4   :  { %p2936_p1 = scmp.lt.u32.totalorder %s2932_s28, %s3589_s1 }
   0x6   :  { %p2938_p2 = pnand %p2936_p1, %p2933_p0 }
   0x8   :  { %2941 = shalt.err (!%p2938_p2)
}
   0x9   :  { %s2942_s10 = scalar_lea.vmem %s24_s25, 2048  ;;  %p2947_p4 = scmp.lt.s32.totalorder %s24_s25, %s24_s25 }
   0xa   :  { %p2943_p3 = scmp.ne.s32.totalorder %s24_s25, %s2942_s10  ;;  %p2948_p5 = scmp.lt.s32.totalorder %s2942_s10, %s2942_s10 }
   0xc   :  { %p2949_p6 = por %p2948_p5, %p2947_p4 }
   0xe   :  { %p2950_p7 = pnand %p2949_p6, %p2943_p3 }
  0x10   :  { %2953 = shalt.err (!%p2950_p7)
}
  0x11   :  { %s3005_s11 = smov 256   ;;  %s3006_s12 = smov 16  }
  0x12   :  { %29 = dma.hbm_to_vmem [thread:$0]  %s3589_s1, 2048, %s24_s25, [#allocation3], %s3005_s11, %s3005_s11, %s3006_s12  }
  0x13   :  { %2998 = dma.done.wait [#allocation3], 2048  }
  0x14   :  { %2999 = vsyncadd [#allocation3], 4294965248  ;;  %v3007_v0 = vmov 0.0   ;;  %v71_v1 = vlaneseq  ;;  %v46_v2 = vld [vmem:[#allocation2 + $0x8] sm:$0xff]  ;;  %v48_v3 = vld [vmem:[#allocation2 + $0x18] sm:$0xff]  ;;  %vm77_vm1 = vcmask 130048  }
  0x15   :  { %231 = vmatprep.mubr.f32.mxu1 %v3007_v0  ;;  %145 = vmatprep.mubr.f32.mxu0 %v3007_v0  ;;  %v45_v4 = vld [vmem:[#allocation2] sm:$0xff]  ;;  %v3073_v5 = vpack.c.bf16 %v48_v3, %v46_v2  ;;  %v47_v6 = vld [vmem:[#allocation2 + $0x10] sm:$0xff]  ;;  %v50_v7 = vld [vmem:[#allocation2 + $0x28] sm:$0xff]  ;;  %vm163_vm2 = vcmask 523264   ;;  %v3008_v57 = vmov 0.0|0.0   ;;  %vm3009_vm3 = vmmov 0  }
  0x16   :  { %v52_v8 = vld [vmem:[#allocation2 + $0x38] sm:$0xff]  ;;  %v3075_v9 = vpack.c.bf16 %v47_v6, %v45_v4  ;;  %v49_v11 = vld [vmem:[#allocation2 + $0x20] sm:$0xff]  ;;  %v51_v12 = vld [vmem:[#allocation2 + $0x30] sm:$0xff]  ;;  %v3079_v14 = vand.u32 127, %v71_v1  ;;  %v154_v35 = vshrl.u32 %v71_v1, 7  ;;  %s3010_s13 = smov 64  }
  0x17   :  { %v3077_v10 = vpack.c.bf16 %v52_v8, %v50_v7  ;;  %v54_v13 = vld [vmem:[#allocation2 + $0x48] sm:$0xff]  ;;  %2586 = vmatprep.subr.bf16.mxu1 %v3073_v5  ;;  %v56_v15 = vld [vmem:[#allocation2 + $0x58] sm:$0xff]  ;;  %v3083_v16 = vpack.c.bf16 %v51_v12, %v49_v11  ;;  %v53_v17 = vld [vmem:[#allocation2 + $0x40] sm:$0xff]  ;;  %vm340_vm4 = vcmask 125952   ;;  %s3012_s20 = smov 48   ;;  %s3013_s21 = smov 80  }
  0x18   :  { %2588 = vmatpush1.bf16.msra.mxu1 %v3075_v9  ;;  %v42_v18 = vld [vmem:[%s3588_s0 + $0x8] sm:$0xff]  ;;  %v3089_v19 = vpack.c.bf16 %v56_v15, %v54_v13  ;;  %v55_v20 = vld [vmem:[#allocation2 + $0x50] sm:$0xff]  ;;  %v44_v22 = vld [vmem:[%s3588_s0 + $0x18] sm:$0xff]  ;;  %vm74_vm0 = vcmp.eq.s32.totalorder %v3079_v14, 1  ;;  %v155_v36 = vsub.s32 0, %v154_v35  ;;  %v159_v48 = vsub.s32 1, %v154_v35 }
  0x19   :  { %2590 = vmatprep.subr.bf16.mxu1 %v3077_v10  ;;  %v58_v21 = vld [vmem:[#allocation2 + $0x68] sm:$0xff]  ;;  %v60_v23 = vld [vmem:[#allocation2 + $0x78] sm:$0xff]  ;;  %v3094_v24 = vpack.c.bf16 %v44_v22, %v42_v18  ;;  %v41_v25 = vld [vmem:[%s3588_s0] sm:$0xff]  ;;  %v3106_v28 = vpack.c.bf16 %v55_v20, %v53_v17  ;;  %v2316_v32 = vsel %vm74_vm0, 1.0, %v3007_v0  ;;  %s3015_s22 = smov [#allocation6]  }
  0x1a   :  { %v43_v26 = vld [vmem:[%s3588_s0 + $0x10] sm:$0xff]  ;;  %v3110_v29 = vpack.c.bf16 %v60_v23, %v58_v21  ;;  %v57_v30 = vld [vmem:[#allocation2 + $0x60] sm:$0xff]  ;;  %v63_v55 = vld [vmem:[%s3591_s3 + $0x8] sm:$0xff]  ;;  %s3014_s0 = smov 96   ;;  %s2303_s23 = sshll.u32 %s3015_s22, 4  ;;  %s2304_s23 = int_to_ptr.vmem [resolvable:$true] %s2303_s23 }
  0x1b   :  { %v3103_v27 = vpack.c.bf16 %v43_v26, %v41_v25  ;;  %2582 = vmatprep.subr.bf16.mxu0 %v3094_v24  ;;  %v59_v31 = vld [vmem:[#allocation2 + $0x70] sm:$0xff]  ;;  %v73_v34 = vld [vmem:[%s3593_s5] sm:$0xf]  ;;  %v65_v59 = vld [vmem:[%s3591_s3 + $0x18] sm:$0xff]  ;;  %s2954_s24 = scalar_lea.vmem %s2304_s23, 64  ;;  %p2959_p9 = scmp.lt.s32.totalorder %s2304_s23, %s2304_s23 }
  0x1c   :  { %2592 = vmatpush1.bf16.msra.mxu1 %v3083_v16  ;;  %v3115_v33 = vpack.c.bf16 %v59_v31, %v57_v30  ;;  %v61_v38 = vld [vmem:[%s3590_s2] sm:$0x3]  ;;  %v64_v56 = vld [vmem:[%s3591_s3 + $0x10] sm:$0xff]  ;;  %v67_v63 = vld [vmem:[%s3591_s3 + $0x28] sm:$0xff]  ;;  %p2955_p8 = scmp.ne.s32.totalorder %s2304_s23, %s2954_s24  ;;  %p2960_p10 = scmp.lt.s32.totalorder %s2954_s24, %s2954_s24 }
  0x1d   :  { %2594 = vmatprep.subr.bf16.mxu1 %v3089_v19  ;;  %2584 = vmatpush1.bf16.msra.mxu0 %v3103_v27  ;;  %v3130_v40 = vrot.slane %v61_v38, %v155_v36  ;;  %v3133_v49 = vrot.slane %v61_v38, %v159_v48  ;;  %v62_v54 = vld [vmem:[%s3591_s3] sm:$0xff]  ;;  %v3155_v60 = vpack.c.bf16 %v65_v59, %v64_v56  ;;  %v68_v2 = vld [vmem:[%s3591_s3 + $0x30] sm:$0xff]  ;;  %v69_v3 = vld [vmem:[%s3591_s3 + $0x38] sm:$0xff] }
  0x1e   :  { %2601 = vmatprep.subr.bf16.mxu0 %v3008_v57  ;;  %v3146_v58 = vpack.c.bf16 %v63_v55, %v62_v54  ;;  %v66_v62 = vld [vmem:[%s3591_s3 + $0x20] sm:$0xff]  ;;  %v3177_v4 = vpack.c.bf16 %v69_v3, %v68_v2  ;;  %p2961_p11 = por %p2960_p10, %p2959_p9 }
  0x1f   :  { %v3166_v1 = vpack.c.bf16 %v67_v63, %v66_v62  ;;  %v3203_v17 = vld [vmem:[%s3592_s4] ss:$0 sm:$0xff] }
  0x20   :  { %2596 = vmatpush1.bf16.msra.mxu1 %v3106_v28  ;;  %2317 = vmatmul.mubr.msk.f32.vlgmr.msra.gmra.mrb[0].mxu0 %vm77_vm1, %v2316_v32  ;;  %p2962_p12 = pnand %p2961_p11, %p2955_p8 }
  0x21   :  { %2598 = vmatprep.subr.bf16.mxu1 %v3110_v29  ;;  %2445 = vmatprep.mubr.msk.f32.mxu0 %vm3009_vm3, %v3007_v0 }
  0x22   :  { %2603 = vmatpush3.bf16.msra.mxu0 %v3146_v58 }
  0x23   :  { %2604 = vmatprep.subr.bf16.mxu0 %v3008_v57 }
  0x24   :  { %2600 = vmatpush1.bf16.msra.mxu1 %v3115_v33 }
  0x25   :  { %2614 = vmatprep.subr.bf16.mxu1 %v3094_v24 }
  0x26   :  { %2606 = vmatpush3.bf16.msra.mxu0 %v3155_v60 }
  0x27   :  { %2318 = vmatmul.mubr.msk.f32.vlgmr.msra.gmra.mrb[0].mxu1 %vm163_vm2, %v73_v34  ;;  %2607 = vmatprep.subr.bf16.mxu0 %v3008_v57 }
  0x28   :  { %2616 = vmatpush1.bf16.msra.mxu1 %v3103_v27  ;;  %440 = vmatprep.mubr.f32.mxu1 %v3007_v0 }
  0x29   :  { %2633 = vmatprep.subr.bf16.mxu1 %v3008_v57 }
  0x2a   :  { %2609 = vmatpush3.bf16.msra.mxu0 %v3166_v1 }
  0x2b   :  { %2610 = vmatprep.subr.bf16.mxu0 %v3008_v57 }
  0x2e   :  { %2612 = vmatpush3.bf16.msra.mxu0 %v3177_v4 }
  0x2f   :  { %2618 = vmatprep.subr.bf16.mxu0 %v3073_v5 }
  0xf3   :  { %v147_v37 = vpop.f32.mrb[0].mxu0 }
  0xf4   :  { %v149_v39 = vpop.f32.mrb[1].mxu0 }
  0xfa   :  { %v233_v41 = vpop.f32.mrb[0].mxu1 }
  0xfb   :  { %v234_v42 = vadd.f32 %v233_v41, %v3130_v40  ;;  %v235_v43 = vpop.f32.mrb[1].mxu1 }
  0xfc   :  { %v236_v50 = vadd.f32 %v235_v43, %v3133_v49 }
  0xfd   :  { %v238_v44 = vadd.f32 %v234_v42, %v147_v37 }
  0xff   :  { %v2319_v45 = vmul.f32 -1.442695, %v238_v44 }
 0x101   :  { %2851 = vpow2.f32 %v2319_v45 }
 0x10b   :  { %v2852_v46 = vpop.eup %2851 }
 0x10c   :  { %v242_v47 = vadd.f32 1.0, %v2852_v46 }
 0x10e   :  { %2853 = vrcp.f32 %v242_v47 }
 0x118   :  { %v2854_v51 = vpop.eup %2853 }
 0x119   :  { %v245_v52 = vmul.f32 %v2854_v51, %v236_v50  ;;  %v248_v7 = vsub.f32 1.0, %v2854_v51 }
 0x11b   :  { %v246_v53 = vadd.f32 %v245_v52, %v149_v39 }
 0x11d   :  { %2855 = vtanh.f32 %v246_v53 }
 0x127   :  { %v2856_v61 = vpop.eup %2855 }
 0x128   :  { %250 = vrot.lane.b32.xlu0 %v2856_v61, %s3010_s13 }
 0x12c   :  { %254 = vrot.lane.b32.xlu0 %v73_v34, %s3010_s13 }
 0x19a   :  { %v251_v6 = vpop.permute.xlu0 %250 }
 0x19b   :  { %v253_v11 = vmul.f32 %v251_v6, %v248_v7 }
 0x19e   :  { %v255_v8 = vpop.permute.xlu0 %254 }
 0x19f   :  { %v257_v12 = vmul.f32 %v2854_v51, %v255_v8 }
 0x1a1   :  { %v3182_v13 = vadd.f32 %v257_v12, %v253_v11 }
 0x1a3   :  { %266 = vrot.lane.b32.xlu1 %v3182_v13, %s3010_s13 }
 0x215   :  { %v267_v15 = vpop.permute.xlu1 %266 }
 0x216   :  { %2446 = vmatmul.mubr.msk.f32.vlgmr.msra.gmra.mrb[2].mxu0 %vm163_vm2, %v267_v15 }
 0x217   :  { %2620 = vmatpush1.bf16.msra.mxu0 %v3075_v9  ;;  %511 = vmatprep.mubr.f32.mxu0 %v3007_v0 }
 0x218   :  { %2622 = vmatprep.subr.bf16.mxu0 %v3077_v10 }
 0x21b   :  { %2624 = vmatpush1.bf16.msra.mxu0 %v3083_v16 }
 0x21c   :  { %2626 = vmatprep.subr.bf16.mxu0 %v3089_v19 }
 0x21f   :  { %2628 = vmatpush1.bf16.msra.mxu0 %v3106_v28 }
 0x220   :  { %2630 = vmatprep.subr.bf16.mxu0 %v3110_v29 }
 0x223   :  { %2632 = vmatpush1.bf16.msra.mxu0 %v3115_v33 }
 0x224   :  { %2646 = vmatprep.subr.bf16.mxu0 %v3094_v24 }
 0x226   :  { %2324 = vmatmul.mubr.msk.f32.vlgmr.msra.gmra.mrb[4].mxu0 %vm163_vm2, %v267_v15 }
 0x227   :  { %2648 = vmatpush1.bf16.msra.mxu0 %v3103_v27  ;;  %710 = vmatprep.mubr.f32.mxu0 %v3007_v0 }
 0x228   :  { %2665 = vmatprep.subr.bf16.mxu0 %v3008_v57 }
 0x2e9   :  { %v336_v18 = vpop.f32.mrb[2].mxu0 }
 0x2ea   :  { %v3206_v20 = vadd.f32 %v3203_v17, %v336_v18  ;;  %v2447_v21 = vpop.f32.mrb[3].mxu0 }
 0x2ec   :  { %v341_v22 = vsel %vm340_vm4, %v3206_v20, -inf }
 0x2ed   :  { %342 = vmax.xlane.f32.xlu1 %v341_v22 }
 0x2f9   :  { %v513_v23 = vpop.f32.mrb[4].mxu0 }
 0x2fa   :  { %v515_v25 = vpop.f32.mrb[5].mxu0  ;;  %v514_v46 = vadd.f32 %v513_v23, %v3130_v40 }
 0x2fb   :  { %v516_v54 = vadd.f32 %v515_v25, %v3133_v49 }
 0x37a   :  { %v3210_v26 = vpop.xlane.xlu1 %342 }
 0x37b   :  { %vm353_vm5 = vcmp.eq.f32.partialorder %v3206_v20, %v3210_v26 }
 0x37c   :  { %v354_v30 = vsel %vm353_vm5, %v3079_v14, 16 }
 0x37d   :  { %v355_v31 = vsel %vm340_vm4, %v354_v30, 2147483647 }
 0x37e   :  { %v357_v32 = vshra.s32 %v355_v31, 16  ;;  %v356_v35 = vand.u32 65535, %v355_v31 }
 0x380   :  { %v359_v34 = vcvt.s32.f32 %v357_v32  ;;  %v358_v37 = vcvt.s32.f32 %v356_v35 }
 0x382   :  { %360 = vmin.xlane.f32.xlu0 %v359_v34 }
 0x40f   :  { %v361_v36 = vpop.xlane.xlu0 %360 }
 0x410   :  { %vm362_vm6 = vcmp.eq.f32.partialorder %v359_v34, %v361_v36  ;;  %v367_v39 = vcvt.f32.s32 %v361_v36 }
 0x411   :  { %v363_v38 = vsel %vm362_vm6, %v358_v37, inf }
 0x412   :  { %364 = vmin.xlane.f32.xlu0 %v363_v38  ;;  %v368_v42 = vshll.u32 %v367_v39, 16 }
 0x49f   :  { %v365_v41 = vpop.xlane.xlu0 %364 }
 0x4a0   :  { %v366_v43 = vcvt.f32.s32 %v365_v41 }
 0x4a2   :  { %v369_v44 = vadd.s32 %v368_v42, %v366_v43 }
 0x4a4   :  { %vm370_vm7 = vcmp.eq.s32.totalorder %v3079_v14, %v369_v44 }
 0x4a5   :  { %v2322_v45 = vsel %vm370_vm7, 1.0, %v3007_v0 }
 0x4a6   :  { %2323 = vmatmul.mubr.msk.f32.vlgmr.msra.gmra.mrb[2].mxu1 %vm77_vm1, %v2322_v45 }
 0x4a7   :  { %2635 = vmatpush3.bf16.msra.mxu1 %v3146_v58  ;;  %2464 = vmatprep.mubr.msk.f32.mxu1 %vm3009_vm3, %v3007_v0 }
 0x4a8   :  { %2636 = vmatprep.subr.bf16.mxu1 %v3008_v57 }
 0x4ab   :  { %2638 = vmatpush3.bf16.msra.mxu1 %v3155_v60 }
 0x4ac   :  { %2639 = vmatprep.subr.bf16.mxu1 %v3008_v57 }
 0x4af   :  { %2641 = vmatpush3.bf16.msra.mxu1 %v3166_v1 }
 0x4b0   :  { %2642 = vmatprep.subr.bf16.mxu1 %v3008_v57 }
 0x4b3   :  { %2644 = vmatpush3.bf16.msra.mxu1 %v3177_v4 }
 0x4b4   :  { %2650 = vmatprep.subr.bf16.mxu1 %v3073_v5 }
 0x579   :  { %v442_v47 = vpop.f32.mrb[2].mxu1 }
 0x57a   :  { %v518_v48 = vadd.f32 %v514_v46, %v442_v47  ;;  %v444_v50 = vpop.f32.mrb[3].mxu1 }
 0x57c   :  { %v2325_v51 = vmul.f32 -1.442695, %v518_v48 }
 0x57e   :  { %2857 = vpow2.f32 %v2325_v51 }
 0x588   :  { %v2858_v52 = vpop.eup %2857 }
 0x589   :  { %v522_v53 = vadd.f32 1.0, %v2858_v52 }
 0x58b   :  { %2859 = vrcp.f32 %v522_v53 }
 0x595   :  { %v2860_v55 = vpop.eup %2859 }
 0x596   :  { %v525_v56 = vmul.f32 %v2860_v55, %v516_v54  ;;  %v528_v62 = vsub.f32 1.0, %v2860_v55  ;;  %v534_v2 = vmul.f32 %v2860_v55, %v3182_v13 }
 0x598   :  { %v526_v59 = vadd.f32 %v525_v56, %v444_v50 }
 0x59a   :  { %2861 = vtanh.f32 %v526_v59 }
 0x5a4   :  { %v2862_v61 = vpop.eup %2861 }
 0x5a5   :  { %530 = vrot.lane.b32.xlu1 %v2862_v61, %s3010_s13 }
 0x617   :  { %v531_v63 = vpop.permute.xlu1 %530 }
 0x618   :  { %v533_v3 = vmul.f32 %v531_v63, %v528_v62 }
 0x61a   :  { %v3233_v6 = vadd.f32 %v534_v2, %v533_v3 }
 0x61c   :  { %537 = vrot.lane.b32.xlu0 %v3233_v6, %s3010_s13 }
 0x68e   :  { %v538_v7 = vpop.permute.xlu0 %537 }
 0x68f   :  { %2465 = vmatmul.mubr.msk.f32.vlgmr.msra.gmra.mrb[4].mxu1 %vm163_vm2, %v538_v7 }
 0x690   :  { %2652 = vmatpush1.bf16.msra.mxu1 %v3075_v9  ;;  %781 = vmatprep.mubr.f32.mxu1 %v3007_v0 }
 0x691   :  { %2654 = vmatprep.subr.bf16.mxu1 %v3077_v10 }
 0x694   :  { %2656 = vmatpush1.bf16.msra.mxu1 %v3083_v16 }
 0x695   :  { %2658 = vmatprep.subr.bf16.mxu1 %v3089_v19 }
 0x698   :  { %2660 = vmatpush1.bf16.msra.mxu1 %v3106_v28 }
 0x699   :  { %2662 = vmatprep.subr.bf16.mxu1 %v3110_v29 }
 0x69c   :  { %2664 = vmatpush1.bf16.msra.mxu1 %v3115_v33 }
 0x69d   :  { %2678 = vmatprep.subr.bf16.mxu1 %v3094_v24 }
 0x69f   :  { %2329 = vmatmul.mubr.msk.f32.vlgmr.msra.gmra.mrb[6].mxu1 %vm163_vm2, %v538_v7 }
 0x6a0   :  { %2680 = vmatpush1.bf16.msra.mxu1 %v3103_v27  ;;  %980 = vmatprep.mubr.f32.mxu1 %v3007_v0 }
 0x6a1   :  { %2697 = vmatprep.subr.bf16.mxu1 %v3008_v57 }
 0x762   :  { %v607_v8 = vpop.f32.mrb[4].mxu1 }
 0x763   :  { %v3252_v11 = vadd.f32 %v3203_v17, %v607_v8  ;;  %v2466_v12 = vpop.f32.mrb[5].mxu1 }
 0x765   :  { %v611_v13 = vsel %vm340_vm4, %v3252_v11, -inf }
 0x766   :  { %612 = vmax.xlane.f32.xlu1 %v611_v13 }
 0x772   :  { %v783_v15 = vpop.f32.mrb[6].mxu1 }
 0x773   :  { %v785_v18 = vpop.f32.mrb[7].mxu1  ;;  %v784_v43 = vadd.f32 %v783_v15, %v3130_v40 }
 0x774   :  { %v786_v51 = vadd.f32 %v785_v18, %v3133_v49 }
 0x7f3   :  { %v3256_v21 = vpop.xlane.xlu1 %612 }
 0x7f4   :  { %vm623_vm8 = vcmp.eq.f32.partialorder %v3252_v11, %v3256_v21 }
 0x7f5   :  { %v624_v22 = vsel %vm623_vm8, %v3079_v14, 16 }
 0x7f6   :  { %v625_v23 = vsel %vm340_vm4, %v624_v22, 2147483647 }
 0x7f7   :  { %v627_v25 = vshra.s32 %v625_v23, 16  ;;  %v626_v31 = vand.u32 65535, %v625_v23 }
 0x7f9   :  { %v629_v30 = vcvt.s32.f32 %v627_v25  ;;  %v628_v34 = vcvt.s32.f32 %v626_v31 }
 0x7fb   :  { %630 = vmin.xlane.f32.xlu0 %v629_v30 }
 0x888   :  { %v631_v32 = vpop.xlane.xlu0 %630 }
 0x889   :  { %vm632_vm9 = vcmp.eq.f32.partialorder %v629_v30, %v631_v32  ;;  %v637_v36 = vcvt.f32.s32 %v631_v32 }
 0x88a   :  { %v633_v35 = vsel %vm632_vm9, %v628_v34, inf }
 0x88b   :  { %634 = vmin.xlane.f32.xlu1 %v633_v35  ;;  %v638_v38 = vshll.u32 %v637_v36, 16 }
 0x918   :  { %v635_v37 = vpop.xlane.xlu1 %634 }
 0x919   :  { %v636_v39 = vcvt.f32.s32 %v635_v37 }
 0x91b   :  { %v639_v41 = vadd.s32 %v638_v38, %v636_v39 }
 0x91d   :  { %vm640_vm10 = vcmp.eq.s32.totalorder %v3079_v14, %v639_v41 }
 0x91e   :  { %v2327_v42 = vsel %vm640_vm10, 1.0, %v3007_v0 }
 0x91f   :  { %2328 = vmatmul.mubr.msk.f32.vlgmr.msra.gmra.mrb[6].mxu0 %vm77_vm1, %v2327_v42 }
 0x920   :  { %2667 = vmatpush3.bf16.msra.mxu0 %v3146_v58  ;;  %2483 = vmatprep.mubr.msk.f32.mxu0 %vm3009_vm3, %v3007_v0 }
 0x921   :  { %2668 = vmatprep.subr.bf16.mxu0 %v3008_v57 }
 0x924   :  { %2670 = vmatpush3.bf16.msra.mxu0 %v3155_v60 }
 0x925   :  { %2671 = vmatprep.subr.bf16.mxu0 %v3008_v57 }
 0x928   :  { %2673 = vmatpush3.bf16.msra.mxu0 %v3166_v1 }
 0x929   :  { %2674 = vmatprep.subr.bf16.mxu0 %v3008_v57 }
 0x92c   :  { %2676 = vmatpush3.bf16.msra.mxu0 %v3177_v4 }
 0x92d   :  { %2682 = vmatprep.subr.bf16.mxu0 %v3073_v5 }
 0x9f2   :  { %v712_v44 = vpop.f32.mrb[6].mxu0 }
 0x9f3   :  { %v788_v45 = vadd.f32 %v784_v43, %v712_v44  ;;  %v714_v46 = vpop.f32.mrb[7].mxu0 }
 0x9f5   :  { %v2330_v47 = vmul.f32 -1.442695, %v788_v45 }
 0x9f7   :  { %2863 = vpow2.f32 %v2330_v47 }
 0xa01   :  { %v2864_v48 = vpop.eup %2863 }
 0xa02   :  { %v792_v50 = vadd.f32 1.0, %v2864_v48 }
 0xa04   :  { %2865 = vrcp.f32 %v792_v50 }
 0xa0e   :  { %v2866_v52 = vpop.eup %2865 }
 0xa0f   :  { %v795_v53 = vmul.f32 %v2866_v52, %v786_v51  ;;  %v798_v56 = vsub.f32 1.0, %v2866_v52  ;;  %v804_v61 = vmul.f32 %v2866_v52, %v3233_v6 }
 0xa11   :  { %v796_v54 = vadd.f32 %v795_v53, %v714_v46 }
 0xa13   :  { %2867 = vtanh.f32 %v796_v54 }
 0xa1d   :  { %v2868_v55 = vpop.eup %2867 }
 0xa1e   :  { %800 = vrot.lane.b32.xlu0 %v2868_v55, %s3010_s13 }
 0xa90   :  { %v801_v59 = vpop.permute.xlu0 %800 }
 0xa91   :  { %v803_v62 = vmul.f32 %v801_v59, %v798_v56 }
 0xa93   :  { %v3279_v63 = vadd.f32 %v804_v61, %v803_v62 }
 0xa95   :  { %807 = vrot.lane.b32.xlu1 %v3279_v63, %s3010_s13 }
 0xb07   :  { %v808_v2 = vpop.permute.xlu1 %807 }
 0xb08   :  { %2484 = vmatmul.mubr.msk.f32.vlgmr.msra.gmra.mrb[8].mxu0 %vm163_vm2, %v808_v2 }
 0xb09   :  { %2684 = vmatpush1.bf16.msra.mxu0 %v3075_v9  ;;  %1051 = vmatprep.mubr.f32.mxu0 %v3007_v0 }
 0xb0a   :  { %2686 = vmatprep.subr.bf16.mxu0 %v3077_v10 }
 0xb0d   :  { %2688 = vmatpush1.bf16.msra.mxu0 %v3083_v16 }
 0xb0e   :  { %2690 = vmatprep.subr.bf16.mxu0 %v3089_v19 }
 0xb11   :  { %2692 = vmatpush1.bf16.msra.mxu0 %v3106_v28 }
 0xb12   :  { %2694 = vmatprep.subr.bf16.mxu0 %v3110_v29 }
 0xb15   :  { %2696 = vmatpush1.bf16.msra.mxu0 %v3115_v33 }
 0xb16   :  { %2710 = vmatprep.subr.bf16.mxu0 %v3094_v24 }
 0xb18   :  { %2334 = vmatmul.mubr.msk.f32.vlgmr.msra.gmra.mrb[10].mxu0 %vm163_vm2, %v808_v2 }
 0xb19   :  { %2712 = vmatpush1.bf16.msra.mxu0 %v3103_v27  ;;  %1250 = vmatprep.mubr.f32.mxu0 %v3007_v0 }
 0xb1a   :  { %2729 = vmatprep.subr.bf16.mxu0 %v3008_v57 }
 0xbdb   :  { %v877_v3 = vpop.f32.mrb[8].mxu0 }
 0xbdc   :  { %v3298_v6 = vadd.f32 %v3203_v17, %v877_v3  ;;  %v2485_v7 = vpop.f32.mrb[9].mxu0 }
 0xbde   :  { %v881_v8 = vsel %vm340_vm4, %v3298_v6, -inf }
 0xbdf   :  { %882 = vmax.xlane.f32.xlu1 %v881_v8 }
 0xbeb   :  { %v1053_v12 = vpop.f32.mrb[10].mxu0 }
 0xbec   :  { %v1055_v13 = vpop.f32.mrb[11].mxu0  ;;  %v1054_v42 = vadd.f32 %v1053_v12, %v3130_v40 }
 0xbed   :  { %v1056_v50 = vadd.f32 %v1055_v13, %v3133_v49 }
 0xc6c   :  { %v3302_v15 = vpop.xlane.xlu1 %882 }
 0xc6d   :  { %vm893_vm11 = vcmp.eq.f32.partialorder %v3298_v6, %v3302_v15 }
 0xc6e   :  { %v894_v18 = vsel %vm893_vm11, %v3079_v14, 16 }
 0xc6f   :  { %v895_v22 = vsel %vm340_vm4, %v894_v18, 2147483647 }
 0xc70   :  { %v897_v23 = vshra.s32 %v895_v22, 16  ;;  %v896_v30 = vand.u32 65535, %v895_v22 }
 0xc72   :  { %v899_v25 = vcvt.s32.f32 %v897_v23  ;;  %v898_v32 = vcvt.s32.f32 %v896_v30 }
 0xc74   :  { %900 = vmin.xlane.f32.xlu0 %v899_v25 }
 0xd01   :  { %v901_v31 = vpop.xlane.xlu0 %900 }
 0xd02   :  { %vm902_vm12 = vcmp.eq.f32.partialorder %v899_v25, %v901_v31  ;;  %v907_v35 = vcvt.f32.s32 %v901_v31 }
 0xd03   :  { %v903_v34 = vsel %vm902_vm12, %v898_v32, inf }
 0xd04   :  { %904 = vmin.xlane.f32.xlu0 %v903_v34  ;;  %v908_v37 = vshll.u32 %v907_v35, 16 }
 0xd91   :  { %v905_v36 = vpop.xlane.xlu0 %904 }
 0xd92   :  { %v906_v38 = vcvt.f32.s32 %v905_v36 }
 0xd94   :  { %v909_v39 = vadd.s32 %v908_v37, %v906_v38 }
 0xd96   :  { %vm910_vm13 = vcmp.eq.s32.totalorder %v3079_v14, %v909_v39 }
 0xd97   :  { %v2332_v41 = vsel %vm910_vm13, 1.0, %v3007_v0 }
 0xd98   :  { %2333 = vmatmul.mubr.msk.f32.vlgmr.msra.gmra.mrb[8].mxu1 %vm77_vm1, %v2332_v41 }
 0xd99   :  { %2699 = vmatpush3.bf16.msra.mxu1 %v3146_v58  ;;  %2502 = vmatprep.mubr.msk.f32.mxu1 %vm3009_vm3, %v3007_v0 }
 0xd9a   :  { %2700 = vmatprep.subr.bf16.mxu1 %v3008_v57 }
 0xd9d   :  { %2702 = vmatpush3.bf16.msra.mxu1 %v3155_v60 }
 0xd9e   :  { %2703 = vmatprep.subr.bf16.mxu1 %v3008_v57 }
 0xda1   :  { %2705 = vmatpush3.bf16.msra.mxu1 %v3166_v1 }
 0xda2   :  { %2706 = vmatprep.subr.bf16.mxu1 %v3008_v57 }
 0xda5   :  { %2708 = vmatpush3.bf16.msra.mxu1 %v3177_v4 }
 0xda6   :  { %2714 = vmatprep.subr.bf16.mxu1 %v3073_v5 }
 0xe6b   :  { %v982_v43 = vpop.f32.mrb[8].mxu1 }
 0xe6c   :  { %v1058_v44 = vadd.f32 %v1054_v42, %v982_v43  ;;  %v984_v45 = vpop.f32.mrb[9].mxu1 }
 0xe6e   :  { %v2335_v46 = vmul.f32 -1.442695, %v1058_v44 }
 0xe70   :  { %2869 = vpow2.f32 %v2335_v46 }
 0xe7a   :  { %v2870_v47 = vpop.eup %2869 }
 0xe7b   :  { %v1062_v48 = vadd.f32 1.0, %v2870_v47 }
 0xe7d   :  { %2871 = vrcp.f32 %v1062_v48 }
 0xe87   :  { %v2872_v51 = vpop.eup %2871 }
 0xe88   :  { %v1065_v52 = vmul.f32 %v2872_v51, %v1056_v50  ;;  %v1068_v55 = vsub.f32 1.0, %v2872_v51  ;;  %v1074_v59 = vmul.f32 %v2872_v51, %v3279_v63 }
 0xe8a   :  { %v1066_v53 = vadd.f32 %v1065_v52, %v984_v45 }
 0xe8c   :  { %2873 = vtanh.f32 %v1066_v53 }
 0xe96   :  { %v2874_v54 = vpop.eup %2873 }
 0xe97   :  { %1070 = vrot.lane.b32.xlu1 %v2874_v54, %s3010_s13 }
 0xf09   :  { %v1071_v56 = vpop.permute.xlu1 %1070 }
 0xf0a   :  { %v1073_v61 = vmul.f32 %v1071_v56, %v1068_v55 }
 0xf0c   :  { %v3325_v62 = vadd.f32 %v1074_v59, %v1073_v61 }
 0xf0e   :  { %1077 = vrot.lane.b32.xlu0 %v3325_v62, %s3010_s13 }
 0xf80   :  { %v1078_v2 = vpop.permute.xlu0 %1077 }
 0xf81   :  { %2503 = vmatmul.mubr.msk.f32.vlgmr.msra.gmra.mrb[10].mxu1 %vm163_vm2, %v1078_v2 }
 0xf82   :  { %2716 = vmatpush1.bf16.msra.mxu1 %v3075_v9  ;;  %1321 = vmatprep.mubr.f32.mxu1 %v3007_v0 }
 0xf83   :  { %2718 = vmatprep.subr.bf16.mxu1 %v3077_v10 }
 0xf86   :  { %2720 = vmatpush1.bf16.msra.mxu1 %v3083_v16 }
 0xf87   :  { %2722 = vmatprep.subr.bf16.mxu1 %v3089_v19 }
 0xf8a   :  { %2724 = vmatpush1.bf16.msra.mxu1 %v3106_v28 }
 0xf8b   :  { %2726 = vmatprep.subr.bf16.mxu1 %v3110_v29 }
 0xf8e   :  { %2728 = vmatpush1.bf16.msra.mxu1 %v3115_v33 }
 0xf8f   :  { %2742 = vmatprep.subr.bf16.mxu1 %v3094_v24 }
 0xf91   :  { %2339 = vmatmul.mubr.msk.f32.vlgmr.msra.gmra.mrb[12].mxu1 %vm163_vm2, %v1078_v2 }
 0xf92   :  { %2744 = vmatpush1.bf16.msra.mxu1 %v3103_v27  ;;  %1520 = vmatprep.mubr.f32.mxu1 %v3007_v0 }
 0xf93   :  { %2761 = vmatprep.subr.bf16.mxu1 %v3008_v57 }
0x1054   :  { %v1147_v63 = vpop.f32.mrb[10].mxu1 }
0x1055   :  { %v3344_v3 = vadd.f32 %v3203_v17, %v1147_v63  ;;  %v2504_v7 = vpop.f32.mrb[11].mxu1 }
0x1057   :  { %v1151_v8 = vsel %vm340_vm4, %v3344_v3, -inf }
0x1058   :  { %1152 = vmax.xlane.f32.xlu1 %v1151_v8 }
0x1064   :  { %v1323_v12 = vpop.f32.mrb[12].mxu1 }
0x1065   :  { %v1325_v13 = vpop.f32.mrb[13].mxu1  ;;  %v1324_v43 = vadd.f32 %v1323_v12, %v3130_v40 }
0x1066   :  { %v1326_v51 = vadd.f32 %v1325_v13, %v3133_v49 }
0x10e5   :  { %v3348_v18 = vpop.xlane.xlu1 %1152 }
0x10e6   :  { %vm1163_vm14 = vcmp.eq.f32.partialorder %v3344_v3, %v3348_v18 }
0x10e7   :  { %v1164_v22 = vsel %vm1163_vm14, %v3079_v14, 16 }
0x10e8   :  { %v1165_v23 = vsel %vm340_vm4, %v1164_v22, 2147483647 }
0x10e9   :  { %v1167_v25 = vshra.s32 %v1165_v23, 16  ;;  %v1166_v31 = vand.u32 65535, %v1165_v23 }
0x10eb   :  { %v1169_v30 = vcvt.s32.f32 %v1167_v25  ;;  %v1168_v34 = vcvt.s32.f32 %v1166_v31 }
0x10ed   :  { %1170 = vmin.xlane.f32.xlu0 %v1169_v30 }
0x117a   :  { %v1171_v32 = vpop.xlane.xlu0 %1170 }
0x117b   :  { %vm1172_vm15 = vcmp.eq.f32.partialorder %v1169_v30, %v1171_v32  ;;  %v1177_v36 = vcvt.f32.s32 %v1171_v32 }
0x117c   :  { %v1173_v35 = vsel %vm1172_vm15, %v1168_v34, inf }
0x117d   :  { %1174 = vmin.xlane.f32.xlu1 %v1173_v35  ;;  %v1178_v38 = vshll.u32 %v1177_v36, 16 }
0x120a   :  { %v1175_v37 = vpop.xlane.xlu1 %1174 }
0x120b   :  { %v1176_v39 = vcvt.f32.s32 %v1175_v37 }
0x120d   :  { %v1179_v41 = vadd.s32 %v1178_v38, %v1176_v39 }
0x120f   :  { %vm1180_vm0 = vcmp.eq.s32.totalorder %v3079_v14, %v1179_v41 }
0x1210   :  { %v2337_v42 = vsel %vm1180_vm0, 1.0, %v3007_v0 }
0x1211   :  { %2338 = vmatmul.mubr.msk.f32.vlgmr.msra.gmra.mrb[12].mxu0 %vm77_vm1, %v2337_v42 }
0x1212   :  { %2731 = vmatpush3.bf16.msra.mxu0 %v3146_v58  ;;  %2521 = vmatprep.mubr.msk.f32.mxu0 %vm3009_vm3, %v3007_v0 }
0x1213   :  { %2732 = vmatprep.subr.bf16.mxu0 %v3008_v57 }
0x1216   :  { %2734 = vmatpush3.bf16.msra.mxu0 %v3155_v60 }
0x1217   :  { %2735 = vmatprep.subr.bf16.mxu0 %v3008_v57 }
0x121a   :  { %2737 = vmatpush3.bf16.msra.mxu0 %v3166_v1 }
0x121b   :  { %2738 = vmatprep.subr.bf16.mxu0 %v3008_v57 }
0x121e   :  { %2740 = vmatpush3.bf16.msra.mxu0 %v3177_v4 }
0x121f   :  { %2746 = vmatprep.subr.bf16.mxu0 %v3073_v5 }
0x12e4   :  { %v1252_v44 = vpop.f32.mrb[12].mxu0 }
0x12e5   :  { %v1328_v45 = vadd.f32 %v1324_v43, %v1252_v44  ;;  %v1254_v46 = vpop.f32.mrb[13].mxu0 }
0x12e7   :  { %v2340_v47 = vmul.f32 -1.442695, %v1328_v45 }
0x12e9   :  { %2875 = vpow2.f32 %v2340_v47 }
0x12f3   :  { %v2876_v48 = vpop.eup %2875 }
0x12f4   :  { %v1332_v50 = vadd.f32 1.0, %v2876_v48 }
0x12f6   :  { %2877 = vrcp.f32 %v1332_v50 }
0x1300   :  { %v2878_v52 = vpop.eup %2877 }
0x1301   :  { %v1335_v53 = vmul.f32 %v2878_v52, %v1326_v51  ;;  %v1338_v56 = vsub.f32 1.0, %v2878_v52  ;;  %v1344_v61 = vmul.f32 %v2878_v52, %v3325_v62 }
0x1303   :  { %v1336_v54 = vadd.f32 %v1335_v53, %v1254_v46 }
0x1305   :  { %2879 = vtanh.f32 %v1336_v54 }
0x130f   :  { %v2880_v55 = vpop.eup %2879 }
0x1310   :  { %1340 = vrot.lane.b32.xlu0 %v2880_v55, %s3010_s13 }
0x1382   :  { %v1341_v59 = vpop.permute.xlu0 %1340 }
0x1383   :  { %v1343_v2 = vmul.f32 %v1341_v59, %v1338_v56 }
0x1385   :  { %v3371_v63 = vadd.f32 %v1344_v61, %v1343_v2 }
0x1387   :  { %1347 = vrot.lane.b32.xlu1 %v3371_v63, %s3010_s13 }
0x13f9   :  { %v1348_v7 = vpop.permute.xlu1 %1347 }
0x13fa   :  { %2522 = vmatmul.mubr.msk.f32.vlgmr.msra.gmra.mrb[14].mxu0 %vm163_vm2, %v1348_v7 }
0x13fb   :  { %2748 = vmatpush1.bf16.msra.mxu0 %v3075_v9  ;;  %1591 = vmatprep.mubr.f32.mxu0 %v3007_v0 }
0x13fc   :  { %2750 = vmatprep.subr.bf16.mxu0 %v3077_v10 }
0x13ff   :  { %2752 = vmatpush1.bf16.msra.mxu0 %v3083_v16 }
0x1400   :  { %2754 = vmatprep.subr.bf16.mxu0 %v3089_v19 }
0x1403   :  { %2756 = vmatpush1.bf16.msra.mxu0 %v3106_v28 }
0x1404   :  { %2758 = vmatprep.subr.bf16.mxu0 %v3110_v29 }
0x1407   :  { %2760 = vmatpush1.bf16.msra.mxu0 %v3115_v33 }
0x1408   :  { %2774 = vmatprep.subr.bf16.mxu0 %v3094_v24 }
0x140a   :  { %2344 = vmatmul.mubr.msk.f32.vlgmr.msra.gmra.mrb[16].mxu0 %vm163_vm2, %v1348_v7 }
0x140b   :  { %2776 = vmatpush1.bf16.msra.mxu0 %v3103_v27  ;;  %1790 = vmatprep.mubr.f32.mxu0 %v3007_v0 }
0x140c   :  { %2793 = vmatprep.subr.bf16.mxu0 %v3008_v57 }
0x14cd   :  { %v1417_v62 = vpop.f32.mrb[14].mxu0 }
0x14ce   :  { %v3390_v8 = vadd.f32 %v3203_v17, %v1417_v62  ;;  %v2523_v12 = vpop.f32.mrb[15].mxu0 }
0x14d0   :  { %v1421_v13 = vsel %vm340_vm4, %v3390_v8, -inf }
0x14d1   :  { %1422 = vmax.xlane.f32.xlu1 %v1421_v13 }
0x14dd   :  { %v1593_v22 = vpop.f32.mrb[16].mxu0 }
0x14de   :  { %v1595_v23 = vpop.f32.mrb[17].mxu0  ;;  %v1594_v46 = vadd.f32 %v1593_v22, %v3130_v40 }
0x14df   :  { %v1596_v54 = vadd.f32 %v1595_v23, %v3133_v49 }
0x155e   :  { %v3394_v25 = vpop.xlane.xlu1 %1422 }
0x155f   :  { %vm1433_vm5 = vcmp.eq.f32.partialorder %v3390_v8, %v3394_v25 }
0x1560   :  { %v1434_v30 = vsel %vm1433_vm5, %v3079_v14, 16 }
0x1561   :  { %v1435_v31 = vsel %vm340_vm4, %v1434_v30, 2147483647 }
0x1562   :  { %v1437_v32 = vshra.s32 %v1435_v31, 16  ;;  %v1436_v35 = vand.u32 65535, %v1435_v31 }
0x1564   :  { %v1439_v34 = vcvt.s32.f32 %v1437_v32  ;;  %v1438_v37 = vcvt.s32.f32 %v1436_v35 }
0x1566   :  { %1440 = vmin.xlane.f32.xlu0 %v1439_v34 }
0x15f3   :  { %v1441_v36 = vpop.xlane.xlu0 %1440 }
0x15f4   :  { %vm1442_vm6 = vcmp.eq.f32.partialorder %v1439_v34, %v1441_v36  ;;  %v1447_v39 = vcvt.f32.s32 %v1441_v36 }
0x15f5   :  { %v1443_v38 = vsel %vm1442_vm6, %v1438_v37, inf }
0x15f6   :  { %1444 = vmin.xlane.f32.xlu0 %v1443_v38  ;;  %v1448_v42 = vshll.u32 %v1447_v39, 16 }
0x1683   :  { %v1445_v41 = vpop.xlane.xlu0 %1444 }
0x1684   :  { %v1446_v43 = vcvt.f32.s32 %v1445_v41 }
0x1686   :  { %v1449_v44 = vadd.s32 %v1448_v42, %v1446_v43 }
0x1688   :  { %vm1450_vm7 = vcmp.eq.s32.totalorder %v3079_v14, %v1449_v44 }
0x1689   :  { %v2342_v45 = vsel %vm1450_vm7, 1.0, %v3007_v0 }
0x168a   :  { %2343 = vmatmul.mubr.msk.f32.vlgmr.msra.gmra.mrb[14].mxu1 %vm77_vm1, %v2342_v45 }
0x168b   :  { %2763 = vmatpush3.bf16.msra.mxu1 %v3146_v58  ;;  %2540 = vmatprep.mubr.msk.f32.mxu1 %vm3009_vm3, %v3007_v0 }
0x168c   :  { %2764 = vmatprep.subr.bf16.mxu1 %v3008_v57 }
0x168f   :  { %2766 = vmatpush3.bf16.msra.mxu1 %v3155_v60 }
0x1690   :  { %2767 = vmatprep.subr.bf16.mxu1 %v3008_v57 }
0x1693   :  { %2769 = vmatpush3.bf16.msra.mxu1 %v3166_v1 }
0x1694   :  { %2770 = vmatprep.subr.bf16.mxu1 %v3008_v57 }
0x1697   :  { %2772 = vmatpush3.bf16.msra.mxu1 %v3177_v4 }
0x1698   :  { %2778 = vmatprep.subr.bf16.mxu1 %v3073_v5 }
0x175d   :  { %v1522_v47 = vpop.f32.mrb[14].mxu1 }
0x175e   :  { %v1598_v48 = vadd.f32 %v1594_v46, %v1522_v47  ;;  %v1524_v50 = vpop.f32.mrb[15].mxu1 }
0x1760   :  { %v2345_v51 = vmul.f32 -1.442695, %v1598_v48 }
0x1762   :  { %2881 = vpow2.f32 %v2345_v51 }
0x176c   :  { %v2882_v52 = vpop.eup %2881 }
0x176d   :  { %v1602_v53 = vadd.f32 1.0, %v2882_v52 }
0x176f   :  { %2883 = vrcp.f32 %v1602_v53 }
0x1779   :  { %v2884_v55 = vpop.eup %2883 }
0x177a   :  { %v1605_v56 = vmul.f32 %v2884_v55, %v1596_v54  ;;  %v1608_v2 = vsub.f32 1.0, %v2884_v55  ;;  %v1614_v62 = vmul.f32 %v2884_v55, %v3371_v63 }
0x177c   :  { %v1606_v59 = vadd.f32 %v1605_v56, %v1524_v50 }
0x177e   :  { %2885 = vtanh.f32 %v1606_v59 }
0x1788   :  { %v2886_v61 = vpop.eup %2885 }
0x1789   :  { %1610 = vrot.lane.b32.xlu1 %v2886_v61, %s3010_s13 }
0x17fb   :  { %v1611_v7 = vpop.permute.xlu1 %1610 }
0x17fc   :  { %v1613_v12 = vmul.f32 %v1611_v7, %v1608_v2 }
0x17fe   :  { %v3417_v13 = vadd.f32 %v1614_v62, %v1613_v12 }
0x1800   :  { %1617 = vrot.lane.b32.xlu0 %v3417_v13, %s3010_s13 }
0x1872   :  { %v1618_v22 = vpop.permute.xlu0 %1617 }
0x1873   :  { %2541 = vmatmul.mubr.msk.f32.vlgmr.msra.gmra.mrb[16].mxu1 %vm163_vm2, %v1618_v22 }
0x1874   :  { %2780 = vmatpush1.bf16.msra.mxu1 %v3075_v9  ;;  %1861 = vmatprep.mubr.f32.mxu1 %v3007_v0 }
0x1875   :  { %2782 = vmatprep.subr.bf16.mxu1 %v3077_v10 }
0x1878   :  { %2784 = vmatpush1.bf16.msra.mxu1 %v3083_v16 }
0x1879   :  { %2786 = vmatprep.subr.bf16.mxu1 %v3089_v19 }
0x187c   :  { %2788 = vmatpush1.bf16.msra.mxu1 %v3106_v28 }
0x187d   :  { %2790 = vmatprep.subr.bf16.mxu1 %v3110_v29 }
0x1880   :  { %2792 = vmatpush1.bf16.msra.mxu1 %v3115_v33 }
0x1881   :  { %2806 = vmatprep.subr.bf16.mxu1 %v3094_v24 }
0x1883   :  { %2349 = vmatmul.mubr.msk.f32.vlgmr.msra.gmra.mrb[18].mxu1 %vm163_vm2, %v1618_v22 }
0x1884   :  { %2808 = vmatpush1.bf16.msra.mxu1 %v3103_v27  ;;  %2060 = vmatprep.mubr.f32.mxu1 %v3007_v0 }
0x1885   :  { %2825 = vmatprep.subr.bf16.mxu1 %v3008_v57 }
0x1946   :  { %v1687_v63 = vpop.f32.mrb[16].mxu1 }
0x1947   :  { %v3436_v23 = vadd.f32 %v3203_v17, %v1687_v63  ;;  %v2542_v30 = vpop.f32.mrb[17].mxu1 }
0x1949   :  { %v1691_v31 = vsel %vm340_vm4, %v3436_v23, -inf }
0x194a   :  { %1692 = vmax.xlane.f32.xlu1 %v1691_v31 }
0x1956   :  { %v1863_v32 = vpop.f32.mrb[18].mxu1 }
0x1957   :  { %v1865_v34 = vpop.f32.mrb[19].mxu1  ;;  %v1864_v50 = vadd.f32 %v1863_v32, %v3130_v40 }
0x1958   :  { %v1866_v59 = vadd.f32 %v1865_v34, %v3133_v49 }
0x19d7   :  { %v3440_v24 = vpop.xlane.xlu1 %1692 }
0x19d8   :  { %vm1703_vm8 = vcmp.eq.f32.partialorder %v3436_v23, %v3440_v24 }
0x19d9   :  { %v1704_v27 = vsel %vm1703_vm8, %v3079_v14, 16 }
0x19da   :  { %v1705_v35 = vsel %vm340_vm4, %v1704_v27, 2147483647 }
0x19db   :  { %v1707_v36 = vshra.s32 %v1705_v35, 16  ;;  %v1706_v38 = vand.u32 65535, %v1705_v35 }
0x19dd   :  { %v1709_v37 = vcvt.s32.f32 %v1707_v36  ;;  %v1708_v41 = vcvt.s32.f32 %v1706_v38 }
0x19df   :  { %1710 = vmin.xlane.f32.xlu0 %v1709_v37 }
0x1a6c   :  { %v1711_v39 = vpop.xlane.xlu0 %1710 }
0x1a6d   :  { %vm1712_vm9 = vcmp.eq.f32.partialorder %v1709_v37, %v1711_v39  ;;  %v1717_v43 = vcvt.f32.s32 %v1711_v39 }
0x1a6e   :  { %v1713_v42 = vsel %vm1712_vm9, %v1708_v41, inf }
0x1a6f   :  { %1714 = vmin.xlane.f32.xlu1 %v1713_v42  ;;  %v1718_v45 = vshll.u32 %v1717_v43, 16 }
0x1afc   :  { %v1715_v44 = vpop.xlane.xlu1 %1714 }
0x1afd   :  { %v1716_v46 = vcvt.f32.s32 %v1715_v44 }
0x1aff   :  { %v1719_v47 = vadd.s32 %v1718_v45, %v1716_v46 }
0x1b01   :  { %vm1720_vm10 = vcmp.eq.s32.totalorder %v3079_v14, %v1719_v47 }
0x1b02   :  { %v2347_v48 = vsel %vm1720_vm10, 1.0, %v3007_v0 }
0x1b03   :  { %2348 = vmatmul.mubr.msk.f32.vlgmr.msra.gmra.mrb[18].mxu0 %vm77_vm1, %v2347_v48 }
0x1b04   :  { %2795 = vmatpush3.bf16.msra.mxu0 %v3146_v58  ;;  %2559 = vmatprep.mubr.msk.f32.mxu0 %vm3009_vm3, %v3007_v0 }
0x1b05   :  { %2796 = vmatprep.subr.bf16.mxu0 %v3008_v57 }
0x1b08   :  { %2798 = vmatpush3.bf16.msra.mxu0 %v3155_v60 }
0x1b09   :  { %2799 = vmatprep.subr.bf16.mxu0 %v3008_v57 }
0x1b0c   :  { %2801 = vmatpush3.bf16.msra.mxu0 %v3166_v1 }
0x1b0d   :  { %2802 = vmatprep.subr.bf16.mxu0 %v3008_v57 }
0x1b10   :  { %2804 = vmatpush3.bf16.msra.mxu0 %v3177_v4 }
0x1b11   :  { %2810 = vmatprep.subr.bf16.mxu0 %v3073_v5 }
0x1bd6   :  { %v1792_v51 = vpop.f32.mrb[18].mxu0 }
0x1bd7   :  { %v1868_v52 = vadd.f32 %v1864_v50, %v1792_v51  ;;  %v1794_v53 = vpop.f32.mrb[19].mxu0 }
0x1bd9   :  { %v2350_v54 = vmul.f32 -1.442695, %v1868_v52 }
0x1bdb   :  { %2887 = vpow2.f32 %v2350_v54 }
0x1be5   :  { %v2888_v55 = vpop.eup %2887 }
0x1be6   :  { %v1872_v56 = vadd.f32 1.0, %v2888_v55  ;;  %v3507_v55 = vsub.f32 %v3252_v11, %v3256_v21 }
0x1be8   :  { %2889 = vrcp.f32 %v1872_v56  ;;  %v3512_v56 = vsub.f32 %v3344_v3, %v3348_v18 }
0x1bf2   :  { %v2890_v61 = vpop.eup %2889 }
0x1bf3   :  { %v1875_v2 = vmul.f32 %v2890_v61, %v1866_v59  ;;  %v1878_v5 = vsub.f32 1.0, %v2890_v61  ;;  %v1884_v22 = vmul.f32 %v2890_v61, %v3417_v13  ;;  %v1155_v59 = vmul.f32 1.442695, %v3512_v56 }
0x1bf4   :  { %v3517_v61 = vsub.f32 %v3436_v23, %v3440_v24  ;;  %v884_v23 = vsub.f32 %v3298_v6, %v3302_v15  ;;  %v2931_v15 = vld [vmem:[%s3592_s4] ss:$0 sm:$0xff]  ;;  %s3011_s4 = smov 32  }
0x1bf5   :  { %v1876_v7 = vadd.f32 %v1875_v2, %v1794_v53 }
0x1bf6   :  { %v1695_v2 = vmul.f32 1.442695, %v3517_v61  ;;  %v885_v24 = vmul.f32 1.442695, %v884_v23 }
0x1bf7   :  { %2891 = vtanh.f32 %v1876_v7 }
0x1c01   :  { %v2892_v62 = vpop.eup %2891 }
0x1c02   :  { %1880 = vrot.lane.b32.xlu0 %v2892_v62, %s3010_s13 }
0x1c74   :  { %v1881_v12 = vpop.permute.xlu0 %1880 }
0x1c75   :  { %v1883_v63 = vmul.f32 %v1881_v12, %v1878_v5  ;;  %v3528_v12 = vsub.f32 %v3390_v8, %v3394_v25 }
0x1c77   :  { %v3463_v30 = vadd.f32 %v1884_v22, %v1883_v63  ;;  %v1425_v22 = vmul.f32 1.442695, %v3528_v12 }
0x1c79   :  { %1887 = vrot.lane.b32.xlu1 %v3463_v30, %s3010_s13 }
0x1ceb   :  { %v1888_v31 = vpop.permute.xlu1 %1887 }
0x1cec   :  { %2560 = vmatmul.mubr.msk.f32.vlgmr.msra.gmra.mrb[20].mxu0 %vm163_vm2, %v1888_v31 }
0x1ced   :  { %2812 = vmatpush1.bf16.msra.mxu0 %v3075_v9  ;;  %2131 = vmatprep.mubr.f32.mxu0 %v3007_v0 }
0x1cee   :  { %2814 = vmatprep.subr.bf16.mxu0 %v3077_v10 }
0x1cf1   :  { %2816 = vmatpush1.bf16.msra.mxu0 %v3083_v16 }
0x1cf2   :  { %2818 = vmatprep.subr.bf16.mxu0 %v3089_v19 }
0x1cf5   :  { %2820 = vmatpush1.bf16.msra.mxu0 %v3106_v28 }
0x1cf6   :  { %2822 = vmatprep.subr.bf16.mxu0 %v3110_v29 }
0x1cf9   :  { %2824 = vmatpush1.bf16.msra.mxu0 %v3115_v33 }
0x1cfc   :  { %2354 = vmatmul.mubr.msk.f32.vlgmr.msra.gmra.mrb[22].mxu0 %vm163_vm2, %v1888_v31 }
0x1dbf   :  { %v1957_v13 = vpop.f32.mrb[20].mxu0 }
0x1dc0   :  { %v3478_v32 = vadd.f32 %v3203_v17, %v1957_v13  ;;  %v2561_v9 = vpop.f32.mrb[21].mxu0 }
0x1dc2   :  { %v1961_v10 = vsel %vm340_vm4, %v3478_v32, -inf }
0x1dc3   :  { %1962 = vmax.xlane.f32.xlu1 %v1961_v10 }
0x1dcf   :  { %v2133_v16 = vpop.f32.mrb[22].mxu0 }
0x1dd0   :  { %v2135_v34 = vpop.f32.mrb[23].mxu0 }
0x1e50   :  { %v3482_v19 = vpop.xlane.xlu1 %1962 }
0x1e51   :  { %vm1973_vm11 = vcmp.eq.f32.partialorder %v3478_v32, %v3482_v19  ;;  %v3533_v63 = vsub.f32 %v3478_v32, %v3482_v19 }
0x1e52   :  { %v1974_v28 = vsel %vm1973_vm11, %v3079_v14, 16 }
0x1e53   :  { %v1975_v29 = vsel %vm340_vm4, %v1974_v28, 2147483647  ;;  %v1965_v31 = vmul.f32 1.442695, %v3533_v63 }
0x1e54   :  { %v1977_v33 = vshra.s32 %v1975_v29, 16  ;;  %v1976_v17 = vand.u32 65535, %v1975_v29 }
0x1e56   :  { %v1979_v27 = vcvt.s32.f32 %v1977_v33  ;;  %v1978_v36 = vcvt.s32.f32 %v1976_v17 }
0x1e58   :  { %1980 = vmin.xlane.f32.xlu0 %v1979_v27 }
0x1ee5   :  { %v1981_v35 = vpop.xlane.xlu0 %1980 }
0x1ee6   :  { %vm1982_vm12 = vcmp.eq.f32.partialorder %v1979_v27, %v1981_v35  ;;  %v1987_v38 = vcvt.f32.s32 %v1981_v35 }
0x1ee7   :  { %v1983_v37 = vsel %vm1982_vm12, %v1978_v36, inf }
0x1ee8   :  { %1984 = vmin.xlane.f32.xlu0 %v1983_v37  ;;  %v1988_v41 = vshll.u32 %v1987_v38, 16 }
0x1f75   :  { %v1985_v39 = vpop.xlane.xlu0 %1984 }
0x1f76   :  { %v1986_v42 = vcvt.f32.s32 %v1985_v39 }
0x1f78   :  { %v1989_v43 = vadd.s32 %v1988_v41, %v1986_v42 }
0x1f7a   :  { %vm1990_vm13 = vcmp.eq.s32.totalorder %v3079_v14, %v1989_v43  ;;  %v2134_v14 = vadd.f32 %v2133_v16, %v3130_v40 }
0x1f7b   :  { %v2352_v44 = vsel %vm1990_vm13, 1.0, %v3007_v0 }
0x1f7c   :  { %2353 = vmatmul.mubr.msk.f32.vlgmr.msra.gmra.mrb[20].mxu1 %vm77_vm1, %v2352_v44 }
0x1f7d   :  { %2827 = vmatpush3.bf16.msra.mxu1 %v3146_v58  ;;  %2578 = vmatprep.mubr.msk.f32.mxu1 %vm3009_vm3, %v3007_v0  ;;  %vm2285_vm3 = vcmask 519168  }
0x1f7e   :  { %2828 = vmatprep.subr.bf16.mxu1 %v3008_v57 }
0x1f81   :  { %2830 = vmatpush3.bf16.msra.mxu1 %v3155_v60  ;;  %v2136_v60 = vadd.f32 %v2135_v34, %v3133_v49  ;;  %v615_v49 = vmul.f32 1.442695, %v3507_v55 }
0x1f82   :  { %2831 = vmatprep.subr.bf16.mxu1 %v3008_v57 }
0x1f85   :  { %2833 = vmatpush3.bf16.msra.mxu1 %v3166_v1 }
0x1f86   :  { %2834 = vmatprep.subr.bf16.mxu1 %v3008_v57 }
0x1f89   :  { %2836 = vmatpush3.bf16.msra.mxu1 %v3177_v4 }
0x204f   :  { %v2062_v45 = vpop.f32.mrb[20].mxu1 }
0x2050   :  { %v2138_v46 = vadd.f32 %v2134_v14, %v2062_v45  ;;  %v2064_v58 = vpop.f32.mrb[21].mxu1 }
0x2052   :  { %v2355_v47 = vmul.f32 -1.442695, %v2138_v46 }
0x2054   :  { %2893 = vpow2.f32 %v2355_v47 }
0x205e   :  { %v2894_v0 = vpop.eup %2893 }
0x205f   :  { %v2142_v48 = vadd.f32 1.0, %v2894_v0 }
0x2061   :  { %2895 = vrcp.f32 %v2142_v48 }
0x206b   :  { %v2896_v50 = vpop.eup %2895 }
0x206c   :  { %v2145_v51 = vmul.f32 %v2896_v50, %v2136_v60  ;;  %v2148_v57 = vsub.f32 1.0, %v2896_v50  ;;  %v2154_v40 = vmul.f32 %v2896_v50, %v3463_v30  ;;  %v3537_v30 = vsub.f32 %v3206_v20, %v3210_v26 }
0x206e   :  { %v2146_v52 = vadd.f32 %v2145_v51, %v2064_v58  ;;  %v345_v13 = vmul.f32 1.442695, %v3537_v30 }
0x2070   :  { %2897 = vtanh.f32 %v2146_v52 }
0x2071   :  { %2899 = vpow2.f32 %v615_v49 }
0x2072   :  { %2901 = vpow2.f32 %v1155_v59 }
0x2073   :  { %2903 = vpow2.f32 %v1695_v2 }
0x2074   :  { %2905 = vpow2.f32 %v885_v24 }
0x2075   :  { %2907 = vpow2.f32 %v1425_v22 }
0x2076   :  { %2909 = vpow2.f32 %v1965_v31 }
0x2077   :  { %2911 = vpow2.f32 %v345_v13 }
0x207a   :  { %v2898_v1 = vpop.eup %2897 }
0x207b   :  { %2150 = vrot.lane.b32.xlu1 %v2898_v1, %s3010_s13  ;;  %v2900_v7 = vpop.eup %2899 }
0x207c   :  { %v617_v11 = vsel %vm340_vm4, %v2900_v7, 0.0  ;;  %v2902_v21 = vpop.eup %2901 }
0x207d   :  { %v1157_v62 = vsel %vm340_vm4, %v2902_v21, 0.0  ;;  %v2904_v3 = vpop.eup %2903 }
0x207e   :  { %v1697_v18 = vsel %vm340_vm4, %v2904_v3, 0.0  ;;  %v2906_v9 = vpop.eup %2905 }
0x207f   :  { %v887_v20 = vsel %vm340_vm4, %v2906_v9, 0.0  ;;  %v2908_v26 = vpop.eup %2907 }
0x2080   :  { %v1427_v10 = vsel %vm340_vm4, %v2908_v26, 0.0  ;;  %v2910_v16 = vpop.eup %2909 }
0x2081   :  { %v1967_v34 = vsel %vm340_vm4, %v2910_v16, 0.0  ;;  %v2912_v19 = vpop.eup %2911 }
0x2082   :  { %v347_v28 = vsel %vm340_vm4, %v2912_v19, 0.0 }
0x20ed   :  { %v2151_v4 = vpop.permute.xlu1 %2150 }
0x20ee   :  { %v2153_v53 = vmul.f32 %v2151_v4, %v2148_v57 }
0x20f0   :  { %v2155_v54 = vadd.f32 %v2154_v40, %v2153_v53 }
0x20f2   :  { %2157 = vrot.lane.b32.xlu0 %v2155_v54, %s3010_s13 }
0x2111   :  { %618 = vadd.xlane.f32.xlu0 %v617_v11 }
0x2115   :  { %1158 = vadd.xlane.f32.xlu0 %v1157_v62 }
0x2119   :  { %1698 = vadd.xlane.f32.xlu0 %v1697_v18 }
0x2164   :  { %v2158_v5 = vpop.permute.xlu0 %2157 }
0x2165   :  { %2579 = vmatmul.mubr.msk.f32.vlgmr.msra.gmra.mrb[22].mxu1 %vm163_vm2, %v2158_v5  ;;  %2286 = vst.msk [vmem:[#allocation6] sm:$0xf] %vm2285_vm3, %v2158_v5 }
0x219e   :  { %v619_v29 = vpop.xlane.xlu0 %618 }
0x21a2   :  { %v1159_v27 = vpop.xlane.xlu0 %1158 }
0x21a3   :  { %2913 = vlog2.f32 %v1159_v27 }
0x21a6   :  { %v1699_v37 = vpop.xlane.xlu0 %1698 }
0x21ad   :  { %v2914_v38 = vpop.eup %2913 }
0x21ae   :  { %v1161_v44 = vmul.f32 0.6931472, %v2914_v38 }
0x21b0   :  { %v1162_v47 = vsub.f32 %v3512_v56, %v1161_v44 }
0x2238   :  { %v2227_v6 = vpop.f32.mrb[22].mxu1 }
0x2239   :  { %v2228_v8 = vadd.f32 %v2931_v15, %v2227_v6  ;;  %v2580_v25 = vpop.f32.mrb[23].mxu1 }
0x223b   :  { %v2231_v32 = vsel %vm340_vm4, %v2228_v8, -inf }
0x223c   :  { %2232 = vmax.xlane.f32.xlu1 %v2231_v32 }
0x2240   :  { %888 = vadd.xlane.f32.xlu1 %v887_v20 }
0x2244   :  { %1428 = vadd.xlane.f32.xlu1 %v1427_v10 }
0x2248   :  { %1968 = vadd.xlane.f32.xlu1 %v1967_v34 }
0x224c   :  { %348 = vadd.xlane.f32.xlu1 %v347_v28 }
0x22c9   :  { %v2233_v33 = vpop.xlane.xlu1 %2232 }
0x22ca   :  { %v3549_v17 = vsub.f32 %v2228_v8, %v2233_v33 }
0x22cc   :  { %v2235_v35 = vmul.f32 1.442695, %v3549_v17 }
0x22cd   :  { %v889_v36 = vpop.xlane.xlu1 %888 }
0x22ce   :  { %2915 = vpow2.f32 %v2235_v35 }
0x22cf   :  { %2917 = vlog2.f32 %v889_v36 }
0x22d0   :  { %2919 = vlog2.f32 %v1699_v37 }
0x22d1   :  { %v1429_v14 = vpop.xlane.xlu1 %1428  ;;  %2921 = vlog2.f32 %v619_v29 }
0x22d2   :  { %2923 = vlog2.f32 %v1429_v14 }
0x22d5   :  { %v1969_v0 = vpop.xlane.xlu1 %1968 }
0x22d6   :  { %2925 = vlog2.f32 %v1969_v0 }
0x22d8   :  { %v2916_v39 = vpop.eup %2915 }
0x22d9   :  { %v2918_v41 = vpop.eup %2917  ;;  %v2237_v42 = vsel %vm340_vm4, %v2916_v39, 0.0 }
0x22da   :  { %v891_v43 = vmul.f32 0.6931472, %v2918_v41  ;;  %2238 = vadd.xlane.f32.xlu0 %v2237_v42  ;;  %v2920_v46 = vpop.eup %2919 }
0x22db   :  { %v1701_v58 = vmul.f32 0.6931472, %v2920_v46  ;;  %v2922_v60 = vpop.eup %2921 }
0x22dc   :  { %v892_v45 = vsub.f32 %v884_v23, %v891_v43  ;;  %v621_v50 = vmul.f32 0.6931472, %v2922_v60  ;;  %v2924_v51 = vpop.eup %2923 }
0x22dd   :  { %v1702_v48 = vsub.f32 %v3517_v61, %v1701_v58  ;;  %v1431_v52 = vmul.f32 0.6931472, %v2924_v51 }
0x22de   :  { %2248 = vrot.lane.b32.xlu1 %v892_v45, %s3011_s4  ;;  %v622_v1 = vsub.f32 %v3507_v55, %v621_v50 }
0x22df   :  { %v1432_v40 = vsub.f32 %v3528_v12, %v1431_v52 }
0x22e0   :  { %v2926_v57 = vpop.eup %2925 }
0x22e1   :  { %v1971_v4 = vmul.f32 0.6931472, %v2926_v57 }
0x22e2   :  { %2252 = vrot.lane.b32.xlu1 %v1162_v47, %s3012_s20 }
0x22e3   :  { %v1972_v53 = vsub.f32 %v3533_v63, %v1971_v4 }
0x22e6   :  { %2260 = vrot.lane.b32.xlu1 %v1702_v48, %s3013_s21 }
0x22f0   :  { %2244 = vrot.lane.b32.xlu0 %v622_v1, %s3006_s12 }
0x22f4   :  { %2256 = vrot.lane.b32.xlu0 %v1432_v40, %s3010_s13 }
0x22f8   :  { %2264 = vrot.lane.b32.xlu0 %v1972_v53, %s3014_s0 }
0x2367   :  { %v2239_v54 = vpop.xlane.xlu0 %2238 }
0x2368   :  { %2927 = vlog2.f32 %v2239_v54 }
0x2369   :  { %2965 = shalt.err (!%p2962_p12)
}
0x236a   :  { %s2966_s5 = scalar_lea.hbm %s3595_s7, 64 }
0x236b   :  { %p2967_p13 = scmp.ne.s32.totalorder %s3595_s7, %s2966_s5  ;;  %p2970_p0 = scmp.lt.u32.totalorder %s2966_s5, %s3595_s7 }
0x236d   :  { %p2972_p1 = pnand %p2970_p0, %p2967_p13 }
0x236f   :  { %2975 = shalt.err (!%p2972_p1)
}
0x2370   :  { %2306 = dma.vmem_to_hbm [thread:$0]  %s2304_s23, 64, %s3595_s7, [#allocation7]   ;;  %v349_v59 = vpop.xlane.xlu1 %348  ;;  %v2245_v11 = vpop.permute.xlu0 %2244  ;;  %vm2272_vm4 = vcmask 261120   ;;  %vm2274_vm14 = vcmask 392192   ;;  %vm2277_vm15 = vcmask 654336   ;;  %vm2279_vm0 = vcmask 785408  }
0x2371   :  { %s3016_s8 = smov 112   ;;  %2929 = vlog2.f32 %v349_v59  ;;  %s3017_s7 = smov [#allocation5]   ;;  %vm2281_vm5 = vcmask 916480  }
0x2372   :  { %v2928_v55 = vpop.eup %2927  ;;  %s2293_s9 = sshll.u32 %s3017_s7, 4  ;;  %s2294_s9 = int_to_ptr.vmem [resolvable:$true] %s2293_s9 }
0x2373   :  { %v2241_v49 = vmul.f32 0.6931472, %v2928_v55  ;;  %s2976_s10 = scalar_lea.vmem %s2294_s9, 64  ;;  %p2981_p3 = scmp.lt.s32.totalorder %s2294_s9, %s2294_s9 }
0x2374   :  { %v2249_v7 = vpop.permute.xlu1 %2248  ;;  %v2257_v5 = vpop.permute.xlu0 %2256  ;;  %p2977_p2 = scmp.ne.s32.totalorder %s2294_s9, %s2976_s10  ;;  %p2982_p4 = scmp.lt.s32.totalorder %s2976_s10, %s2976_s10 }
0x2375   :  { %v2242_v56 = vsub.f32 %v3549_v17, %v2241_v49 }
0x2376   :  { %p2983_p5 = por %p2982_p4, %p2981_p3 }
0x2377   :  { %2268 = vrot.lane.b32.xlu1 %v2242_v56, %s3016_s8 }
0x2378   :  { %v2253_v3 = vpop.permute.xlu1 %2252  ;;  %v2265_v22 = vpop.permute.xlu0 %2264  ;;  %p2984_p6 = pnand %p2983_p5, %p2977_p2 }
0x237b   :  { %v2930_v61 = vpop.eup %2929 }
0x237c   :  { %v351_v2 = vmul.f32 0.6931472, %v2930_v61  ;;  %v2261_v24 = vpop.permute.xlu1 %2260 }
0x237e   :  { %v352_v21 = vsub.f32 %v3537_v30, %v351_v2 }
0x2380   :  { %v2271_v62 = vsel %vm77_vm1, %v352_v21, %v2245_v11 }
0x2381   :  { %v2273_v18 = vsel %vm2272_vm4, %v2271_v62, %v2249_v7 }
0x2382   :  { %v2275_v23 = vsel %vm2274_vm14, %v2273_v18, %v2253_v3 }
0x2383   :  { %v2276_v12 = vsel %vm163_vm2, %v2275_v23, %v2257_v5 }
0x2384   :  { %v2278_v63 = vsel %vm2277_vm15, %v2276_v12, %v2261_v24 }
0x2385   :  { %v2280_v31 = vsel %vm2279_vm0, %v2278_v63, %v2265_v22 }
0x23e9   :  { %v2269_v30 = vpop.permute.xlu1 %2268 }
0x23ea   :  { %v2282_v6 = vsel %vm2281_vm5, %v2280_v31, %v2269_v30 }
0x23eb   :  { %2283 = vst [vmem:[#allocation5] sm:$0xf] %v2282_v6 }
0x23ec   :  { %2987 = shalt.err (!%p2984_p6)
}
0x23ed   :  { %s2988_s14 = scalar_lea.hbm %s3594_s6, 64 }
0x23ee   :  { %p2989_p7 = scmp.ne.s32.totalorder %s3594_s6, %s2988_s14  ;;  %p2992_p8 = scmp.lt.u32.totalorder %s2988_s14, %s3594_s6 }
0x23f0   :  { %p2994_p9 = pnand %p2992_p8, %p2989_p7 }
0x23f2   :  { %2997 = shalt.err (!%p2994_p9)
}
0x23f3   :  { %2296 = dma.vmem_to_hbm [thread:$0]  %s2294_s9, 64, %s3594_s6, [#allocation4]  }
0x23f4   :  { %3000 = dma.done.wait [#allocation4], 64  }
0x23f5   :  { %3001 = vsyncadd [#allocation4], 4294967232 }
0x23f6   :  { %3002 = dma.done.wait [#allocation7], 64  }
0x23f7   :  { %3003 = vsyncadd [#allocation7], 4294967232 }
0x23f8   :  { %2313 = vsyncpa [#allocation3], 1 }
0x23f9   :  { %2314 = vsyncpa [#allocation4], 1 }
0x23fa   :  { %2315 = vsyncpa [#allocation7], 1 }

</bundles_post_ra>
